<compile_context>
chip_gen: v6e
topology: v6e:2x2x1
jax: 0.10.0
libtpu: 0.0.40
codegen_flags: <defaults>
</compile_context>

<pallas_src>
import math
import functools

import jax
import jax.numpy as jnp
from jax import lax
from jax.experimental import pallas as pl
from jax.experimental.pallas import tpu as pltpu


# -----------------------------------------------------------------------------
# Generation-aware sizing helpers
# -----------------------------------------------------------------------------
def _tpu_generation() -> str:
    try:
        kind = jax.devices()[0].device_kind.lower()
    except Exception:
        kind = ""
    if "v5 lite" in kind or "v5lite" in kind or "v5e" in kind:
        return "v5e"
    if "v6" in kind:
        return "v6e"
    if "v7" in kind:
        return "v7x"
    return "other"


def _vmem_limit_bytes() -> int:
    """Scoped-VMEM budget: ~5/8 of physical, capped at 64 MiB.
    v5e/v6e have 128 MiB physical -> 64 MiB scoped; v7x has only 64 MiB
    physical -> 40 MiB scoped, leaving headroom for internal scratch."""
    phys = None
    try:
        phys = getattr(pltpu.get_tpu_info(), "vmem_capacity_bytes", None)
    except Exception:
        phys = None
    if not phys:
        phys = 64 * 1024 * 1024 if _tpu_generation() == "v7x" else 128 * 1024 * 1024
    return min(int(phys) * 5 // 8, 64 * 1024 * 1024)


def _mxu_rows() -> int:
    # MXU row dimension: 128 on v5e, 256 on v6e/v7x.
    return 128 if _tpu_generation() == "v5e" else 256


def _pick_tile(dim: int, target: int, quanta) -> int:
    """Largest tile <= target that divides `dim` and is a multiple of one of
    `quanta` (tried in order)."""
    if dim <= target:
        return dim
    for q in quanta:
        t = (target // q) * q
        while t >= q:
            if dim % t == 0:
                return t
            t -= q
    # TODO(synk): pad/mask instead of falling back to the full (possibly
    # VMEM-oversized) dimension for awkward M/N/K.
    return dim


def _proj_tiles(M: int, N: int, K: int, dtype, vmem_limit: int):
    gen = _tpu_generation()
    itemsize = jnp.dtype(dtype).itemsize
    if gen == "v5e":
        # v5e MXU is 4x 128x128 at 197 TF/s: per-step compute already amortizes
        # the ~0.35us pipeline overhead; 128-aligned tiles map onto its geometry.
        tm_t, tn_t, tk_t = 256, 512, 512
        lane_quanta = (128,)
    else:
        # v6e/v7x: bigger tiles so each grid step does enough MXU work; prefer
        # 256 multiples to fill the 256x256 MXU.
        tm_t, tn_t, tk_t = 512, 1024, 512
        lane_quanta = (256, 128)
    tm_quanta = (16,) if itemsize == 2 else (8,)

    def vmem_bytes(tm, tn, tk):
        # double-buffered x/w/out tiles + f32 accumulator + double-buffered bias
        return 2 * (tm * tk + tk * tn + tm * tn) * itemsize + tm * tn * 4 + 2 * tn * 4

    tm = _pick_tile(M, tm_t, tm_quanta)
    tn = _pick_tile(N, tn_t, lane_quanta)
    tk = _pick_tile(K, tk_t, lane_quanta)

    # Shrink (largest dim first) if the pipelined working set overshoots the
    # per-generation budget (matters on v7x's 64 MiB VMEM).
    prev = None
    while vmem_bytes(tm, tn, tk) > vmem_limit and (tm, tn, tk) != prev:
        prev = (tm, tn, tk)
        if tn >= tk and tn >= tm and tn > 128:
            tn = _pick_tile(N, max(tn // 2, 128), lane_quanta)
        elif tk >= tm and tk > 128:
            tk = _pick_tile(K, max(tk // 2, 128), lane_quanta)
        elif tm > 8:
            tm = _pick_tile(M, max(tm // 2, 8), tm_quanta)
    return tm, tn, tk


# -----------------------------------------------------------------------------
# Kernel 1: fused QKV projection   y = x @ [Wq*s | Wk | Wv] + [bq*s | bk | bv]
# -----------------------------------------------------------------------------
def _qkv_proj_kernel(x_ref, w_ref, b_ref, o_ref, acc_ref):
    k = pl.program_id(2)

    @pl.when(k == 0)
    def _():
        acc_ref[...] = jnp.zeros_like(acc_ref)

    acc_ref[...] += jnp.dot(x_ref[...], w_ref[...],
                            preferred_element_type=jnp.float32)

    @pl.when(k == pl.num_programs(2) - 1)
    def _():
        o_ref[...] = (acc_ref[...] + b_ref[...]).astype(o_ref.dtype)


def fused_qkv_projection(x2d, w_qkv, b_qkv, *, out_dtype):
    M, K = x2d.shape
    K2, N = w_qkv.shape
    assert K == K2 and b_qkv.shape == (N,)

    vmem_limit = _vmem_limit_bytes()
    tm, tn, tk = _proj_tiles(M, N, K, x2d.dtype, vmem_limit)
    grid = (M // tm, N // tn, K // tk)

    in_bytes = jnp.dtype(x2d.dtype).itemsize
    out_bytes = jnp.dtype(out_dtype).itemsize
    cost = pl.CostEstimate(
        flops=2 * M * N * K + M * N,
        transcendentals=0,
        bytes_accessed=(M * K + K * N) * in_bytes + N * 4 + M * N * out_bytes,
    )

    return pl.pallas_call(
        _qkv_proj_kernel,
        out_shape=jax.ShapeDtypeStruct((M, N), out_dtype),
        grid=grid,
        in_specs=[
            pl.BlockSpec((tm, tk), lambda i, j, k: (i, k)),
            pl.BlockSpec((tk, tn), lambda i, j, k: (k, j)),
            pl.BlockSpec((1, tn), lambda i, j, k: (0, j)),   # bias (f32)
        ],
        out_specs=pl.BlockSpec((tm, tn), lambda i, j, k: (i, j)),
        scratch_shapes=[pltpu.VMEM((tm, tn), jnp.float32)],
        compiler_params=pltpu.CompilerParams(
            dimension_semantics=("parallel", "parallel", "arbitrary"),
            vmem_limit_bytes=vmem_limit),
        cost_estimate=cost,
    )(x2d, w_qkv, b_qkv.astype(jnp.float32).reshape(1, N))


# -----------------------------------------------------------------------------
# Kernel 2: grouped-query attention, grid = (batch, kv_head)
# -----------------------------------------------------------------------------
def _gqa_attn_kernel(q_ref, k_ref, v_ref, o_ref, *, group, seq, head_dim,
                     approx_recip, stack_rows):
    k = k_ref[...]                                   # (S, hd)  shared K head
    v = v_ref[...]                                   # (S, hd)  shared V head

    def _attend(q):
        # scores = Q @ K^T (scale already folded into Wq/bq), no K transpose.
        s = lax.dot_general(q, k, (((1,), (1,)), ((), ())),
                            preferred_element_type=jnp.float32)   # (R, S)
        m = jnp.max(s, axis=-1, keepdims=True)
        e = jnp.exp(s - m)
        denom = jnp.sum(e, axis=-1, keepdims=True)
        p = e * pl.reciprocal(denom, approx=approx_recip)          # EUP slot
        return jnp.dot(p.astype(v.dtype), v, preferred_element_type=jnp.float32)

    if stack_rows:
        # Small S: stack the group's query heads along rows so one MXU matmul
        # serves the whole group.  Row order is (head, seq) == output layout.
        q = jnp.concatenate(
            [q_ref[:, j * head_dim:(j + 1) * head_dim] for j in range(group)],
            axis=0)                                  # (group*S, hd)
        o_ref[...] = _attend(q).astype(o_ref.dtype)
    else:
        # Large S: each (S, hd) matmul already fills the MXU; store per head
        # so live ranges stay short and no deferred concatenate is needed.
        for j in range(group):
            out_j = _attend(q_ref[:, j * head_dim:(j + 1) * head_dim])
            o_ref[pl.ds(j * seq, seq), :] = out_j.astype(o_ref.dtype)


def pallas_gqa_attention(y3, *, dim, query_heads, kv_heads, out_dtype,
                         approx_recip=True):
    B, S, F = y3.shape
    hd = dim // query_heads
    group = query_heads // kv_heads
    kv_out = kv_heads * hd
    assert F == dim + 2 * kv_out

    stack_rows = (group > 1) and (S < _mxu_rows())

    kernel = functools.partial(
        _gqa_attn_kernel, group=group, seq=S, head_dim=hd,
        approx_recip=approx_recip, stack_rows=stack_rows)

    # Feature-axis BlockSpecs express the Q-group / shared-K / shared-V slices
    # (the GQA repeat_interleave) -- no full-(S, F) loads, no in-kernel split
    # of Q/K/V, and B*kv_heads independent "parallel" tiles for megacore.
    q_spec = pl.BlockSpec((None, S, group * hd), lambda b, g: (b, 0, g))
    k_spec = pl.BlockSpec((None, S, hd),
                          lambda b, g, qh=query_heads: (b, 0, qh + g))
    v_spec = pl.BlockSpec((None, S, hd),
                          lambda b, g, qh=query_heads, kvh=kv_heads:
                          (b, 0, qh + kvh + g))
    o_spec = pl.BlockSpec((None, group * S, hd), lambda b, g: (b, g, 0))

    cost = pl.CostEstimate(
        flops=4 * B * query_heads * S * S * hd,
        transcendentals=B * query_heads * S * S,
        bytes_accessed=B * S * F * jnp.dtype(y3.dtype).itemsize
        + B * query_heads * S * hd * jnp.dtype(out_dtype).itemsize,
    )

    # TODO(synk): gate on a VMEM estimate and switch to an S_q/KV-tiled
    # flash-style online softmax for long sequences (earlier on v7x's 64 MiB).
    return pl.pallas_call(
        kernel,
        out_shape=jax.ShapeDtypeStruct((B, query_heads * S, hd), out_dtype),
        grid=(B, kv_heads),
        in_specs=[q_spec, k_spec, v_spec],
        out_specs=o_spec,
        compiler_params=pltpu.CompilerParams(
            dimension_semantics=("parallel", "parallel"),
            vmem_limit_bytes=_vmem_limit_bytes()),
        cost_estimate=cost,
    )(y3, y3, y3)


# -----------------------------------------------------------------------------
# Parameter fusion (done once at init, outside the jitted forward)
# -----------------------------------------------------------------------------
def fuse_qkv_params(params, query_heads):
    """Fuse [Wq|Wk|Wv] / [bq|bk|bv]; fold the 1/sqrt(hd) softmax scale into the
    Q columns (in f32) so the kernels never multiply by it."""
    dim = params["wq"].shape[0]
    scale = 1.0 / math.sqrt(dim // query_heads)
    w_qkv = jnp.concatenate(
        [params["wq"] * scale, params["wk"], params["wv"]], axis=1)
    b_qkv = jnp.concatenate(
        [params["bq"] * scale, params["bk"], params["bv"]], axis=0)
    return w_qkv, b_qkv


# -----------------------------------------------------------------------------
# Full forward (glue in plain JAX, compute in Pallas)
# -----------------------------------------------------------------------------
@functools.partial(jax.jit,
                   static_argnames=("query_heads", "kv_heads", "compute_dtype"))
def grouped_query_attention(x, w_qkv, b_qkv, *, query_heads, kv_heads,
                            compute_dtype=jnp.bfloat16):
    B, S, D = x.shape
    assert D % query_heads == 0 and query_heads % kv_heads == 0
    hd = D // query_heads
    kv_out = kv_heads * hd

    x2d = x.reshape(B * S, D).astype(compute_dtype)

    # One projection kernel for Q, K and V (x read from HBM once).
    y = fused_qkv_projection(x2d, w_qkv.astype(compute_dtype),
                             b_qkv.astype(jnp.float32), out_dtype=compute_dtype)
    y3 = y.reshape(B, S, D + 2 * kv_out)             # free row-major reshape

    attn = pallas_gqa_attention(
        y3, dim=D, query_heads=query_heads, kv_heads=kv_heads,
        out_dtype=compute_dtype, approx_recip=True)   # (B, H*S, hd)

    # Faithful to PyTorch: attention.view(B, S, H*hd) on the contiguous
    # (B, H, S, hd) tensor == raw reshape of the same flat order (free).
    return attn.reshape(B, S, query_heads * hd)


# -----------------------------------------------------------------------------
# Pure-JAX reference (mirrors the PyTorch forward exactly, f32)
# -----------------------------------------------------------------------------
def reference_forward(x, params, query_heads, kv_heads):
    B, S, D = x.shape
    hd = D // query_heads
    group = query_heads // kv_heads

    q = x @ params["wq"] + params["bq"]
    k = x @ params["wk"] + params["bk"]
    v = x @ params["wv"] + params["bv"]

    q = q.reshape(B, S, query_heads, hd).transpose(0, 2, 1, 3)
    k = k.reshape(B, S, kv_heads, hd).transpose(0, 2, 1, 3)
    v = v.reshape(B, S, kv_heads, hd).transpose(0, 2, 1, 3)

    k = jnp.repeat(k, group, axis=1)        # repeat_interleave along heads
    v = jnp.repeat(v, group, axis=1)

    scores = jnp.einsum("bhqd,bhkd->bhqk", q, k) / math.sqrt(hd)
    p = jax.nn.softmax(scores, axis=-1)
    attn = jnp.einsum("bhqk,bhkd->bhqd", p, v)       # (B, H, S, hd)
    return attn.reshape(B, S, query_heads * hd)      # raw .view, like PyTorch


# -----------------------------------------------------------------------------
if __name__ == "__main__":
    # Small config consistent with the module asserts; head_dim = 128 keeps
    # every head slice lane-aligned and the output stores lane-dense.
    B, S = 2, 16
    DIM, QUERY_HEADS, KV_HEADS = 512, 4, 2
    HD = DIM // QUERY_HEADS                  # 128
    KV_OUT = KV_HEADS * HD                   # 256

    key = jax.random.PRNGKey(0)
    kx, kwq, kbq, kwk, kbk, kwv, kbv = jax.random.split(key, 7)

    x = jax.random.normal(kx, (B, S, DIM), dtype=jnp.float32)
    params = {
        "wq": jax.random.normal(kwq, (DIM, DIM), dtype=jnp.float32) * 0.02,
        "bq": jax.random.normal(kbq, (DIM,), dtype=jnp.float32) * 0.02,
        "wk": jax.random.normal(kwk, (DIM, KV_OUT), dtype=jnp.float32) * 0.02,
        "bk": jax.random.normal(kbk, (KV_OUT,), dtype=jnp.float32) * 0.02,
        "wv": jax.random.normal(kwv, (DIM, KV_OUT), dtype=jnp.float32) * 0.02,
        "bv": jax.random.normal(kbv, (KV_OUT,), dtype=jnp.float32) * 0.02,
    }

    # Pre-fuse once (as a real module would at init).
    w_qkv, b_qkv = fuse_qkv_params(params, QUERY_HEADS)

    ref = reference_forward(x, params, QUERY_HEADS, KV_HEADS)

    # f32 fidelity path (approx reciprocal only; everything else exact f32).
    out_f32 = grouped_query_attention(x, w_qkv, b_qkv, query_heads=QUERY_HEADS,
                                      kv_heads=KV_HEADS,
                                      compute_dtype=jnp.float32)
    out_f32 = jax.block_until_ready(out_f32)
    assert out_f32.shape == (B, S, DIM), out_f32.shape
    err = float(jnp.max(jnp.abs(out_f32 - ref)))
    assert jnp.allclose(out_f32, ref, atol=5e-3, rtol=5e-3), \
        f"f32 path max err {err}"

    # bf16 throughput path (default): bf16 MXU inputs and outputs, f32
    # accumulation and softmax math.
    out_bf16 = grouped_query_attention(x, w_qkv, b_qkv, query_heads=QUERY_HEADS,
                                       kv_heads=KV_HEADS,
                                       compute_dtype=jnp.bfloat16)
    out_bf16 = jax.block_until_ready(out_bf16)
    err_bf16 = float(jnp.max(jnp.abs(out_bf16.astype(jnp.float32) - ref)))
    assert jnp.allclose(out_bf16.astype(jnp.float32), ref,
                        atol=5e-2, rtol=5e-2), f"bf16 path max err {err_bf16}"

    print("KERNEL_OK")
</pallas_src>

<mosaic_0001>
module attributes {stable_mosaic.version = 11 : i64} {
  func.func @_gqa_attn_kernel(%arg0: i32, %arg1: i32, %arg2: memref<1x16x256xf32, #tpu.memory_space<vmem>>, %arg3: memref<1x16x128xf32, #tpu.memory_space<vmem>>, %arg4: memref<1x16x128xf32, #tpu.memory_space<vmem>>, %arg5: memref<1x32x128xf32, #tpu.memory_space<vmem>>) attributes {dimension_semantics = [#tpu.dimension_semantics<parallel>, #tpu.dimension_semantics<parallel>], iteration_bounds = array<i64: 2, 2>, scalar_prefetch = 0 : i64, scratch_operands = 0 : i64, tpu.core_type = #tpu.core_type<tc>, window_params = [{transform_indices = @transform_0, window_bounds = array<i64: 1, 16, 256>}, {transform_indices = @transform_1, window_bounds = array<i64: 1, 16, 128>}, {transform_indices = @transform_2, window_bounds = array<i64: 1, 16, 128>}, {transform_indices = @transform_3, window_bounds = array<i64: 1, 32, 128>}]} {
    %c0 = arith.constant 0 : index
    %c0_0 = arith.constant 0 : index
    %c0_1 = arith.constant 0 : index
    %0 = vector.load %arg3[%c0, %c0_0, %c0_1] : memref<1x16x128xf32, #tpu.memory_space<vmem>>, vector<1x16x128xf32>
    %1 = vector.shape_cast %0 : vector<1x16x128xf32> to vector<16x128xf32>
    %c0_2 = arith.constant 0 : index
    %c0_3 = arith.constant 0 : index
    %c0_4 = arith.constant 0 : index
    %2 = vector.load %arg4[%c0_2, %c0_3, %c0_4] : memref<1x16x128xf32, #tpu.memory_space<vmem>>, vector<1x16x128xf32>
    %3 = vector.shape_cast %2 : vector<1x16x128xf32> to vector<16x128xf32>
    %c0_5 = arith.constant 0 : index
    %c0_6 = arith.constant 0 : index
    %c0_7 = arith.constant 0 : index
    %4 = vector.load %arg2[%c0_5, %c0_6, %c0_7] : memref<1x16x256xf32, #tpu.memory_space<vmem>>, vector<1x16x128xf32>
    %5 = vector.shape_cast %4 : vector<1x16x128xf32> to vector<16x128xf32>
    %c0_8 = arith.constant 0 : index
    %c0_9 = arith.constant 0 : index
    %c128 = arith.constant 128 : index
    %6 = vector.load %arg2[%c0_8, %c0_9, %c128] : memref<1x16x256xf32, #tpu.memory_space<vmem>>, vector<1x16x128xf32>
    %7 = vector.shape_cast %6 : vector<1x16x128xf32> to vector<16x128xf32>
    %8 = tpu.concatenate %5, %7 in 0 : vector<16x128xf32>, vector<16x128xf32> -> vector<32x128xf32>
    %cst = arith.constant dense<0.000000e+00> : vector<32x16xf32>
    %9 = tpu.matmul %8, %1, %cst {dimension_numbers = #tpu.dot_dimension_numbers<[1], [1], [0], [0], [0, 0, 1, 0], [], []>} : vector<32x128xf32>, vector<16x128xf32>, vector<32x16xf32> -> vector<32x16xf32>
    %cst_10 = arith.constant dense<0xFF800000> : vector<32xf32>
    %10 = vector.multi_reduction <maximumf>, %9, %cst_10 [1] : vector<32x16xf32> to vector<32xf32>
    %11 = vector.shape_cast %10 : vector<32xf32> to vector<32x1xf32>
    %12 = vector.broadcast %11 : vector<32x1xf32> to vector<32x16xf32>
    %13 = arith.subf %9, %12 : vector<32x16xf32>
    %14 = math.exp %13 : vector<32x16xf32>
    %cst_11 = arith.constant dense<0.000000e+00> : vector<32xf32>
    %15 = vector.multi_reduction <add>, %14, %cst_11 [1] : vector<32x16xf32> to vector<32xf32>
    %16 = vector.shape_cast %15 : vector<32xf32> to vector<32x1xf32>
    %17 = tpu.reciprocal %16 {approx = true} : vector<32x1xf32> -> vector<32x1xf32>
    %18 = vector.broadcast %17 : vector<32x1xf32> to vector<32x16xf32>
    %19 = arith.mulf %14, %18 : vector<32x16xf32>
    %cst_12 = arith.constant dense<0.000000e+00> : vector<32x128xf32>
    %20 = tpu.matmul %19, %3, %cst_12 {dimension_numbers = #tpu.dot_dimension_numbers<[1], [0], [0], [1], [0, 0, 1, 1], [], []>} : vector<32x16xf32>, vector<16x128xf32>, vector<32x128xf32> -> vector<32x128xf32>
    %c0_13 = arith.constant 0 : index
    %c0_14 = arith.constant 0 : index
    %c0_15 = arith.constant 0 : index
    %21 = vector.load %arg5[%c0_13, %c0_14, %c0_15] : memref<1x32x128xf32, #tpu.memory_space<vmem>>, vector<1x32x128xf32>
    %22 = vector.shape_cast %21 : vector<1x32x128xf32> to vector<32x128xf32>
    %23 = vector.shape_cast %20 : vector<32x128xf32> to vector<1x32x128xf32>
    tpu.vector_store %arg5[%c0_13, %c0_14, %c0_15], %23 {strides = array<i32>} : memref<1x32x128xf32, #tpu.memory_space<vmem>>, vector<1x32x128xf32>,
    return
  }
  func.func @transform_0(%arg0: i32, %arg1: i32) -> (i32, i32, i32) {
    %c0_i32 = arith.constant 0 : i32
    %c0_i32_0 = arith.constant 0 : i32
    return %arg0, %c0_i32, %arg1 : i32, i32, i32
  }
  func.func @transform_1(%arg0: i32, %arg1: i32) -> (i32, i32, i32) {
    %c4_i32 = arith.constant 4 : i32
    %0 = arith.addi %c4_i32, %arg1 : i32
    %c0_i32 = arith.constant 0 : i32
    %c0_i32_0 = arith.constant 0 : i32
    return %arg0, %c0_i32, %0 : i32, i32, i32
  }
  func.func @transform_2(%arg0: i32, %arg1: i32) -> (i32, i32, i32) {
    %c6_i32 = arith.constant 6 : i32
    %0 = arith.addi %c6_i32, %arg1 : i32
    %c0_i32 = arith.constant 0 : i32
    %c0_i32_0 = arith.constant 0 : i32
    return %arg0, %c0_i32, %0 : i32, i32, i32
  }
  func.func @transform_3(%arg0: i32, %arg1: i32) -> (i32, i32, i32) {
    %c0_i32 = arith.constant 0 : i32
    %c0_i32_0 = arith.constant 0 : i32
    return %arg0, %arg1, %c0_i32 : i32, i32, i32
  }
}

module attributes {stable_mosaic.version = 11 : i64} {
  func.func @_qkv_proj_kernel(%arg0: i32, %arg1: i32, %arg2: i32, %arg3: memref<32x512xf32, #tpu.memory_space<vmem>>, %arg4: memref<512x1024xf32, #tpu.memory_space<vmem>>, %arg5: memref<1x1024xf32, #tpu.memory_space<vmem>>, %arg6: memref<32x1024xf32, #tpu.memory_space<vmem>>, %arg7: memref<32x1024xf32, #tpu.memory_space<vmem>>) attributes {dimension_semantics = [#tpu.dimension_semantics<parallel>, #tpu.dimension_semantics<parallel>, #tpu.dimension_semantics<arbitrary>], iteration_bounds = array<i64: 1, 1, 1>, scalar_prefetch = 0 : i64, scratch_operands = 1 : i64, tpu.core_type = #tpu.core_type<tc>, window_params = [{transform_indices = @transform_0, window_bounds = array<i64: 32, 512>}, {transform_indices = @transform_1, window_bounds = array<i64: 512, 1024>}, {transform_indices = @transform_2, window_bounds = array<i64: 1, 1024>}, {transform_indices = @transform_3, window_bounds = array<i64: 32, 1024>}]} {
    %c0_i32 = arith.constant 0 : i32
    %0 = arith.cmpi eq, %arg2, %c0_i32 : i32
    %1 = arith.extui %0 : i1 to i32
    %c0_i32_0 = arith.constant 0 : i32
    %2 = arith.cmpi ne, %1, %c0_i32_0 : i32
    scf.if %2 {
      %cst_10 = arith.constant 0.000000e+00 : f32
      %12 = vector.broadcast %cst_10 : f32 to vector<32x1024xf32>
      %c0_11 = arith.constant 0 : index
      %c0_12 = arith.constant 0 : index
      %13 = vector.load %arg7[%c0_11, %c0_12] : memref<32x1024xf32, #tpu.memory_space<vmem>>, vector<32x1024xf32>
      tpu.vector_store %arg7[%c0_11, %c0_12], %12 {strides = array<i32>} : memref<32x1024xf32, #tpu.memory_space<vmem>>, vector<32x1024xf32>,
    } else {
    }
    %c0 = arith.constant 0 : index
    %c0_1 = arith.constant 0 : index
    %3 = vector.load %arg7[%c0, %c0_1] : memref<32x1024xf32, #tpu.memory_space<vmem>>, vector<32x1024xf32>
    %c0_2 = arith.constant 0 : index
    %c0_3 = arith.constant 0 : index
    %4 = vector.load %arg3[%c0_2, %c0_3] : memref<32x512xf32, #tpu.memory_space<vmem>>, vector<32x512xf32>
    %c0_4 = arith.constant 0 : index
    %c0_5 = arith.constant 0 : index
    %5 = vector.load %arg4[%c0_4, %c0_5] : memref<512x1024xf32, #tpu.memory_space<vmem>>, vector<512x1024xf32>
    %cst = arith.constant dense<0.000000e+00> : vector<32x1024xf32>
    %6 = tpu.matmul %4, %5, %cst {dimension_numbers = #tpu.dot_dimension_numbers<[1], [0], [0], [1], [0, 0, 1, 1], [], []>} : vector<32x512xf32>, vector<512x1024xf32>, vector<32x1024xf32> -> vector<32x1024xf32>
    %7 = arith.addf %3, %6 : vector<32x1024xf32>
    %c0_6 = arith.constant 0 : index
    %c0_7 = arith.constant 0 : index
    %8 = vector.load %arg7[%c0_6, %c0_7] : memref<32x1024xf32, #tpu.memory_space<vmem>>, vector<32x1024xf32>
    tpu.vector_store %arg7[%c0_6, %c0_7], %7 {strides = array<i32>} : memref<32x1024xf32, #tpu.memory_space<vmem>>, vector<32x1024xf32>,
    %c0_i32_8 = arith.constant 0 : i32
    %9 = arith.cmpi eq, %arg2, %c0_i32_8 : i32
    %10 = arith.extui %9 : i1 to i32
    %c0_i32_9 = arith.constant 0 : i32
    %11 = arith.cmpi ne, %10, %c0_i32_9 : i32
    scf.if %11 {
      %c0_10 = arith.constant 0 : index
      %c0_11 = arith.constant 0 : index
      %12 = vector.load %arg7[%c0_10, %c0_11] : memref<32x1024xf32, #tpu.memory_space<vmem>>, vector<32x1024xf32>
      %c0_12 = arith.constant 0 : index
      %c0_13 = arith.constant 0 : index
      %13 = vector.load %arg5[%c0_12, %c0_13] : memref<1x1024xf32, #tpu.memory_space<vmem>>, vector<1x1024xf32>
      %14 = vector.broadcast %13 : vector<1x1024xf32> to vector<32x1024xf32>
      %15 = arith.addf %12, %14 : vector<32x1024xf32>
      %c0_14 = arith.constant 0 : index
      %c0_15 = arith.constant 0 : index
      %16 = vector.load %arg6[%c0_14, %c0_15] : memref<32x1024xf32, #tpu.memory_space<vmem>>, vector<32x1024xf32>
      tpu.vector_store %arg6[%c0_14, %c0_15], %15 {strides = array<i32>} : memref<32x1024xf32, #tpu.memory_space<vmem>>, vector<32x1024xf32>,
    } else {
    }
    return
  }
  func.func @transform_0(%arg0: i32, %arg1: i32, %arg2: i32) -> (i32, i32) {
    %c0_i32 = arith.constant 0 : i32
    return %arg0, %arg2 : i32, i32
  }
  func.func @transform_1(%arg0: i32, %arg1: i32, %arg2: i32) -> (i32, i32) {
    %c0_i32 = arith.constant 0 : i32
    return %arg2, %arg1 : i32, i32
  }
  func.func @transform_2(%arg0: i32, %arg1: i32, %arg2: i32) -> (i32, i32) {
    %c0_i32 = arith.constant 0 : i32
    %c0_i32_0 = arith.constant 0 : i32
    return %c0_i32, %arg1 : i32, i32
  }
  func.func @transform_3(%arg0: i32, %arg1: i32, %arg2: i32) -> (i32, i32) {
    %c0_i32 = arith.constant 0 : i32
    return %arg0, %arg1 : i32, i32
  }
}

</mosaic_0001>

<bundles_post_ra>
// kernel: grouped_query_attention.3
= control target key start
LH: loop header
LB: loop body
LE: loop exit
PB: predicated region body
PF: predicated region fallthrough
CT: control target
= control target key end

     0   :  { %s1196_s0 = inlined_call_operand.vmem [shape: f32[2,16,1024], index: 0, kind: input, shape index: {}, may-alias: {0,1,2}]   ;;  %s1197_s1 = inlined_call_operand.vmem [shape: f32[2,16,1024], index: 1, kind: input, shape index: {}, may-alias: {0,1,2}]   ;;  %s1198_s2 = inlined_call_operand.vmem [shape: f32[2,16,1024], index: 2, kind: input, shape index: {}, may-alias: {0,1,2}]   ;;  %s1199_s3 = inlined_call_operand.vmem [shape: f32[2,64,128], index: 3, kind: output, shape index: {}]  }
   0x1   :  { %1201 = sst [smem:[#allocation6_spill]] %s1199_s3 }
   0x2   :  { %s1008_s12 = smov 0   ;;  %s1010_s13 = smov 0  }
   0x3   :  { %s1012_s14 = smov 0   ;;  %s1014_s15 = smov 0  }
   0x4   :  { %s1016_s16 = smov 0   ;;  %s1018_s17 = smov 0  }
   0x5   :  { %s1020_s18 = smov 0   ;;  %s1022_s19 = smov 0  }
   0x6   :  { %s1024_s20 = smov 0   ;;  %s1026_s21 = smov 0  }
   0x7   :  { %s1028_s22 = smov 0  }
   0x8 LB: > { %1202 = sst [smem:[#allocation5_spill]] %s974_s19  ;;  %s22_s23 = sadd.s32 1, %s978_s20  ;;  %s986_s22 = sphi %s1028_s22, %s13_s22   ;;  %s982_s21 = sphi %s1026_s21, %s1217_s21   ;;  %s978_s20 = sphi %s1024_s20, %s1216_s20   ;;  %s974_s19 = sphi %s1022_s19, %s1215_s19   ;;  %s970_s18 = sphi %s1020_s18, %s1214_s18   ;;  %s966_s17 = sphi %s1018_s17, %s1213_s17   ;;  %s962_s16 = sphi %s1016_s16, %s1212_s16   ;;  %s958_s15 = sphi %s1014_s15, %s1211_s15   ;;  %s954_s14 = sphi %s1012_s14, %s1210_s14   ;;  %s950_s13 = sphi %s1010_s13, %s1209_s13   ;;  %s946_s12 = sphi %s1008_s12, %s1208_s12  }
   0x9   : > { %s25_s24 = sadd.s32 1, %s982_s21  ;;  %p23_p0 = scmp.ge.s32.totalorder %s22_s23, 2 }
   0xa   : > { %s34_s25 = sadd.s32 1, %s966_s17  ;;  %p41_p1 = scmp.ne.s32.totalorder %s966_s17, %s962_s16 }
   0xb   : > { %p42_p2 = scmp.eq.s32.totalorder %s986_s22, 0  ;;  %s1219_s23 = smov (%p23_p0, %s22_s23), 0 }
   0xc   : > { %s1221_s24 = smov (!%p23_p0, %s25_s24), %s982_s21  ;;  %s30_s26 = ssub.s32 %s978_s20, %s1219_s23 }
   0xd   : > { %p1076_p3 = por %p42_p2, %p41_p1  ;;  %p27_p4 = scmp.ge.s32.totalorder %s1221_s24, 2 }
   0xe   : > { %s57_s28 = sadd.s32 4, %s978_s20  ;;  %s58_s29 = sadd.s32 4, %s1219_s23 }
   0xf   : > { %s64_s30 = sadd.s32 1, %s958_s15  ;;  %s1223_s24 = smov (%p27_p4, %s1221_s24), 0 }
  0x10   : > { %s60_s4 = ssub.s32 %s57_s28, %s58_s29  ;;  %p71_p5 = scmp.ne.s32.totalorder %s958_s15, %s954_s14 }
  0x11   : > { %s29_s5 = ssub.s32 %s982_s21, %s1223_s24  ;;  %s87_s6 = sadd.s32 6, %s978_s20 }
  0x12   : > { %s31_s7 = sor.u32 %s30_s26, %s29_s5  ;;  %s61_s8 = sor.u32 %s60_s4, %s29_s5 }
  0x13   : > { %p32_p6 = scmp.eq.s32.totalorder %s31_s7, 0  ;;  %p62_p7 = scmp.eq.s32.totalorder %s61_s8, 0 }
  0x14   : > { %p1092_p8 = por %p71_p5, %p42_p2  ;;  %s88_s10 = sadd.s32 6, %s1219_s23 }
  0x15   : > { %s1098_s11 = scalar_select %p32_p6, %s966_s17, %s34_s25  }
  0x16   : > { %s1101_s3 = scalar_select %p62_p7, %s958_s15, %s64_s30  }
  0x17   : > { %s90_s28 = ssub.s32 %s87_s6, %s88_s10  ;;  %s94_s29 = sadd.s32 1, %s950_s13 }
  0x18   : > { %s91_s19 = sor.u32 %s90_s28, %s29_s5  ;;  %p101_p9 = scmp.ne.s32.totalorder %s950_s13, %s946_s12 }
  0x19   : > { %p92_p10 = scmp.eq.s32.totalorder %s91_s19, 0  ;;  %p736_p12 = scmp.ge.s32.totalorder %s986_s22, 4 }
  0x1a   : > { %p1108_p11 = por %p101_p9, %p42_p2 }
  0x1b   : > { %s1113_s4 = scalar_select %p92_p10, %s950_s13, %s94_s29  }
  0x1c   : > { %155 = sbr.rel (%p736_p12) target bundleno = 58 (0x3a), region = 16 }
  0x21   : > { %158 = sbr.rel (!%p1076_p3) target bundleno = 42 (0x2a), region = 20  ;;  %s160_s25 = sand.u32 (%p1076_p3), 1, %s966_s17  }
  0x22   : > { %s738_s30 = sshll.u32 (%p1076_p3), %s978_s20, 1  ;;  %s737_s5 = sshll.u32 (%p1076_p3), %s160_s25, 5 }
  0x23   : > { %s739_s19 = sshll.u32 (%p1076_p3), %s982_s21, 4  ;;  %s162_s29 = scalar_lea.vmem (%p1076_p3), [#allocation2], %s737_s5 }
  0x24   : > { %s165_s6 = sadd.s32 (%p1076_p3), %s739_s19, %s738_s30 }
  0x25   : > { %s740_s7 = sshll.u32 (%p1076_p3), %s165_s6, 3 }
  0x26   : > { %s167_s28 = scalar_lea.vmem %s1196_s0, %s740_s7 }
  0x27   : > { %v180_v0 = vld [vmem:[%s167_s28] sm:$0xff]  ;;  %v182_v1 = vld [vmem:[%s167_s28 + $0x8] sm:$0xff] }
  0x28   : > { %v184_v2 = vld [vmem:[%s167_s28 + $0x40] sm:$0xff]  ;;  %181 = vst [vmem:[%s162_s29] sm:$0xff] %v180_v0  ;;  %183 = vst [vmem:[%s162_s29 + $0x8] sm:$0xff] %v182_v1  ;;  %v186_v3 = vld [vmem:[%s167_s28 + $0x48] sm:$0xff] }
  0x29   : > { %185 = vst [vmem:[%s162_s29 + $0x10] sm:$0xff] %v184_v2  ;;  %187 = vst [vmem:[%s162_s29 + $0x18] sm:$0xff] %v186_v3 }
  0x2a PF: > { %193 = sbr.rel (!%p1092_p8) target bundleno = 50 (0x32), region = 43  ;;  %s195_s27 = sand.u32 (%p1092_p8), 1, %s958_s15  }
  0x2b   : > { %s742_s25 = sshll.u32 (%p1092_p8), %s982_s21, 4  ;;  %s741_s30 = sshll.u32 (%p1092_p8), %s195_s27, 4 }
  0x2c   : > { %s638_s19 = sadd.s32 (%p1092_p8), %s978_s20, %s742_s25  ;;  %s197_s10 = scalar_lea.vmem (%p1092_p8), [#allocation3], %s741_s30 }
  0x2d   : > { %s743_s6 = sshll.u32 (%p1092_p8), %s638_s19, 3 }
  0x2e   : > { %s640_s5 = scalar_lea.vmem (%p1092_p8), %s1197_s1, %s743_s6 }
  0x2f   : > { %v744_v4 = vld [vmem:[%s640_s5 + $0x20] sm:$0xff] }
  0x30   : > { %v745_v5 = vld [vmem:[%s640_s5 + $0x60] sm:$0xff]  ;;  %234 = vst [vmem:[%s197_s10] sm:$0xff] %v744_v4 }
  0x31   : > { %236 = vst [vmem:[%s197_s10 + $0x8] sm:$0xff] %v745_v5 }
  0x32 PF: > { %242 = sbr.rel (!%p1108_p11) target bundleno = 58 (0x3a), region = 81  ;;  %s244_s9 = sand.u32 (%p1108_p11), 1, %s950_s13  }
  0x33   : > { %s747_s28 = sshll.u32 (%p1108_p11), %s982_s21, 4  ;;  %s746_s29 = sshll.u32 (%p1108_p11), %s244_s9, 4 }
  0x34   : > { %s645_s27 = sadd.s32 (%p1108_p11), %s978_s20, %s747_s28  ;;  %s246_s30 = scalar_lea.vmem (%p1108_p11), [#allocation4], %s746_s29 }
  0x35   : > { %s748_s25 = sshll.u32 (%p1108_p11), %s645_s27, 3 }
  0x36   : > { %s647_s6 = scalar_lea.vmem (%p1108_p11), %s1198_s2, %s748_s25 }
  0x37   : > { %v749_v6 = vld [vmem:[%s647_s6 + $0x30] sm:$0xff] }
  0x38   : > { %v750_v7 = vld [vmem:[%s647_s6 + $0x70] sm:$0xff]  ;;  %283 = vst [vmem:[%s246_s30] sm:$0xff] %v749_v6 }
  0x39   : > { %285 = vst [vmem:[%s246_s30 + $0x8] sm:$0xff] %v750_v7 }
  0x3a PF: > { %p751_p13 = scmp.ge.s32.totalorder %s986_s22, 1  ;;  %p290_p0 = scmp.lt.s32.totalorder %s986_s22, 5 }
  0x3c   : > { %p291_p1 = pnand %p751_p13, %p290_p0 }
  0x3d   : > { %s304_s26 = sand.u32 (!%p291_p1), 1, %s954_s14   ;;  %s297_s8 = sand.u32 (!%p291_p1), 1, %s962_s16  }
  0x3e   : > { %294 = sbr.rel (%p291_p1) target bundleno = 787 (0x313), region = 119  ;;  %s753_s5 = sshll.u32 (!%p291_p1), %s304_s26, 4 }
  0x3f   : > { %s752_s10 = sshll.u32 (!%p291_p1), %s297_s8, 5  ;;  %s306_s9 = scalar_lea.vmem (!%p291_p1), [#allocation3], %s753_s5 }
  0x40   : > { %s299_s28 = scalar_lea.vmem (!%p291_p1), [#allocation2], %s752_s10  ;;  %s311_s14 = sand.u32 (!%p291_p1), 1, %s946_s12  }
  0x41   : > { %s754_s16 = sshll.u32 (!%p291_p1), %s311_s14, 4  ;;  %s1206_s27 = sld [smem:[#allocation5_spill]] (!%p291_p1) }
  0x42   : > { %s313_s29 = scalar_lea.vmem (!%p291_p1), [#allocation4], %s754_s16  ;;  %s755_s12 = sshll.u32 (!%p291_p1), %s970_s18, 2 }
  0x43   : > { %v360_v8 = vld [vmem:[%s306_s9 + $0x8] sm:$0xff]  ;;  %v359_v9 = vld [vmem:[%s306_s9] sm:$0xff]  ;;  %vm452_vm0 = vcmask 130048   ;;  %p352_p3 = scmp.lt.s32.totalorder %s755_s12, 7  ;;  %s1207_s26 = sld [smem:[#allocation6_spill]] }
  0x44   : > { %v363_v10 = vld [vmem:[%s299_s28] sm:$0xff]  ;;  %776 = vmatprep.subr.mxu0 %v360_v8  ;;  %v364_v11 = vld [vmem:[%s299_s28 + $0x10] sm:$0xff]  ;;  %v365_v12 = vld [vmem:[%s299_s28 + $0x8] sm:$0xff] }
  0x45   : > { %780 = vmatprep.mubr.f32.mxu0 %v363_v10  ;;  %777 = vmatpush3.xpose.msra.mxu0 %v360_v8  ;;  %v366_v13 = vld [vmem:[%s299_s28 + $0x18] sm:$0xff]  ;;  %v361_v43 = vld [vmem:[%s313_s29] sm:$0xff]  ;;  %s1227_s12 = smov (!%p352_p3, %s755_s12), 7 }
  0x46   : > { %778 = vmatprep.subr.mxu0 %v359_v9  ;;  %v362_v42 = vld [vmem:[%s313_s29 + $0x8] sm:$0xff] }
  0x47   : > { %786 = vmatprep.subr.mxu1 %v362_v42  ;;  %p350_p2 = scmp.lt.s32.totalorder %s1206_s27, 1 }
  0x48   : > { %787 = vmatpush3.msra.mxu1 %v362_v42 }
  0x49   : > { %779 = vmatpush3.xpose.msra.mxu0 %v359_v9  ;;  %788 = vmatprep.subr.mxu1 %v361_v43  ;;  %s1225_s27 = smov (!%p350_p2, %s1206_s27), 1 }
  0x4a   : > { %789 = vmatpush3.msra.mxu1 %v361_v43  ;;  %s756_s25 = sshll.u32 %s1225_s27, 3 }
  0x4b   : > { %s355_s19 = sadd.s32 %s756_s25, %s1227_s12 }
  0x4c   : > { %781 = vmatmul.mubr.f32.vlgmr.msra.gmra.mxu0 %v364_v11  ;;  %s757_s7 = sshll.u32 %s355_s19, 3 }
  0x4d   : > { %783 = vmatprep.mubr.f32.mxu0 %v365_v12  ;;  %s357_s8 = scalar_lea.vmem %s1207_s26, %s757_s7 }
  0x50   : > { %784 = vmatmul.mubr.f32.gmra.mxu0 %v366_v13 }
 0x10c   : > { %v782_v14 = vpop.f32.mrf.mxu0 }
 0x10d   : > { %v456_v19 = vsel %vm452_vm0, %v782_v14, -inf }
 0x10e   : > { %v433_v15 = vpop.f32.mrf.mxu0 }
 0x10f   : > { %v453_v16 = vsel %vm452_vm0, %v433_v15, -inf }
 0x110   : > { %454 = vmax.xlane.f32.xlu0 %v453_v16  ;;  %v785_v17 = vpop.f32.mrf.mxu0 }
 0x111   : > { %v462_v21 = vsel %vm452_vm0, %v785_v17, -inf }
 0x112   : > { %v443_v18 = vpop.f32.mrf.mxu0 }
 0x113   : > { %v459_v20 = vsel %vm452_vm0, %v443_v18, -inf }
 0x114   : > { %457 = vmax.xlane.f32.xlu0 %v456_v19  ;;  %460 = vmax.xlane.f32.xlu1 %v459_v20 }
 0x118   : > { %463 = vmax.xlane.f32.xlu1 %v462_v21 }
 0x199   : > { %v455_v22 = vpop.xlane.xlu0 %454 }
 0x19a   : > { %v465_v23 = vsub.f32 %v433_v15, %v455_v22 }
 0x19c   : > { %v469_v24 = vmul.f32 1.442695, %v465_v23 }
 0x19d   : > { %v458_v25 = vpop.xlane.xlu0 %457  ;;  %v461_v26 = vpop.xlane.xlu1 %460 }
 0x19e   : > { %884 = vpow2.f32 %v469_v24  ;;  %v466_v27 = vsub.f32 %v782_v14, %v458_v25  ;;  %v467_v28 = vsub.f32 %v443_v18, %v461_v26 }
 0x1a0   : > { %v471_v29 = vmul.f32 1.442695, %v466_v27  ;;  %v473_v30 = vmul.f32 1.442695, %v467_v28 }
 0x1a1   : > { %v464_v31 = vpop.xlane.xlu1 %463 }
 0x1a2   : > { %886 = vpow2.f32 %v471_v29  ;;  %v468_v32 = vsub.f32 %v785_v17, %v464_v31 }
 0x1a3   : > { %888 = vpow2.f32 %v473_v30 }
 0x1a4   : > { %v475_v33 = vmul.f32 1.442695, %v468_v32 }
 0x1a6   : > { %890 = vpow2.f32 %v475_v33 }
 0x1ab   : > { %v885_v34 = vpop.eup %884 }
 0x1ac   : > { %v477_v35 = vsel %vm452_vm0, %v885_v34, 0.0 }
 0x1ad   : > { %478 = vadd.xlane.f32.xlu0 %v477_v35 }
 0x1af   : > { %v887_v36 = vpop.eup %886 }
 0x1b0   : > { %v889_v37 = vpop.eup %888  ;;  %v480_v38 = vsel %vm452_vm0, %v887_v36, 0.0 }
 0x1b1   : > { %481 = vadd.xlane.f32.xlu1 %v480_v38  ;;  %v483_v39 = vsel %vm452_vm0, %v889_v37, 0.0 }
 0x1b2   : > { %484 = vadd.xlane.f32.xlu0 %v483_v39 }
 0x1b3   : > { %v891_v40 = vpop.eup %890 }
 0x1b4   : > { %v486_v41 = vsel %vm452_vm0, %v891_v40, 0.0 }
 0x1b5   : > { %487 = vadd.xlane.f32.xlu1 %v486_v41 }
 0x236   : > { %v479_v44 = vpop.xlane.xlu0 %478 }
 0x237   : > { %892 = vrcp.f32 %v479_v44 }
 0x23a   : > { %v482_v45 = vpop.xlane.xlu1 %481 }
 0x23b   : > { %v485_v46 = vpop.xlane.xlu0 %484  ;;  %894 = vrcp.f32 %v482_v45 }
 0x23c   : > { %896 = vrcp.f32 %v485_v46 }
 0x23e   : > { %v488_v47 = vpop.xlane.xlu1 %487 }
 0x23f   : > { %898 = vrcp.f32 %v488_v47 }
 0x244   : > { %v893_v48 = vpop.eup %892 }
 0x245   : > { %v493_v49 = vmul.f32 %v893_v48, %v885_v34 }
 0x247   : > { %790 = vmatprep.mubr.msk.f32.mxu1 %vm452_vm0, %v493_v49 }
 0x248   : > { %v895_v50 = vpop.eup %894 }
 0x249   : > { %v897_v51 = vpop.eup %896  ;;  %v494_v52 = vmul.f32 %v895_v50, %v887_v36 }
 0x24a   : > { %v495_v53 = vmul.f32 %v897_v51, %v889_v37 }
 0x24b   : > { %791 = vmatmul.mubr.msk.f32.vlgmr.msra.gmra.mxu1 %vm452_vm0, %v494_v52 }
 0x24c   : > { %v899_v54 = vpop.eup %898  ;;  %793 = vmatprep.mubr.msk.f32.mxu1 %vm452_vm0, %v495_v53 }
 0x24d   : > { %v496_v55 = vmul.f32 %v899_v54, %v891_v40 }
 0x24f   : > { %794 = vmatmul.mubr.msk.f32.gmra.mxu1 %vm452_vm0, %v496_v55 }
 0x30b   : > { %v792_v56 = vpop.f32.mrf.mxu1 }
 0x30c   : > { %595 = vst [vmem:[%s357_s8 + $0x8] sm:$0xff] %v792_v56 }
 0x30d   : > { %v575_v57 = vpop.f32.mrf.mxu1 }
 0x30e   : > { %594 = vst [vmem:[%s357_s8] sm:$0xff] %v575_v57 }
 0x30f   : > { %v795_v58 = vpop.f32.mrf.mxu1 }
 0x310   : > { %597 = vst [vmem:[%s357_s8 + $0x18] sm:$0xff] %v795_v58 }
 0x311   : > { %v585_v59 = vpop.f32.mrf.mxu1 }
 0x312   : > { %596 = vst [vmem:[%s357_s8 + $0x10] sm:$0xff] %v585_v59 }
 0x313 PF: > { %s13_s22 = sadd.s32 1, %s986_s22   ;;  %s1208_s12 = smov %s950_s13 }
 0x314   : > { %p10_p4 = scmp.ge.s32.totalorder %s13_s22, 6   ;;  %s1209_s13 = smov %s1113_s4 }
 0x315   : > { %s1210_s14 = smov %s958_s15  ;;  %s1211_s15 = smov %s1101_s3 }
 0x316   : > { %s1212_s16 = smov %s966_s17  ;;  %s1213_s17 = smov %s1098_s11 }
 0x317   : > { %s1214_s18 = smov %s978_s20  ;;  %s1215_s19 = smov %s982_s21 }
 0x318   : > { %s1216_s20 = smov %s1219_s23  ;;  %s1217_s21 = smov %s1223_s24 }
 0x319   :  { %12 = sbr.rel (!%p10_p4) target bundleno = 8 (0x8), region = 182 }

// kernel: grouped_query_attention.2
= control target key start
LH: loop header
LB: loop body
LE: loop exit
PB: predicated region body
PF: predicated region fallthrough
CT: control target
= control target key end

     0   :  { %8 = vsyncpa [#allocation4], 0  ;;  %s1927_s0 = inlined_call_operand.hbm [shape: f32[32,512], index: 0, kind: input, shape index: {}]   ;;  %s1928_s1 = inlined_call_operand.hbm [shape: f32[512,1024], index: 1, kind: input, shape index: {}]   ;;  %s1929_s2 = inlined_call_operand.hbm [shape: f32[1,1024], index: 2, kind: input, shape index: {}]   ;;  %s1930_s3 = inlined_call_operand.vmem [shape: f32[32,1024], index: 3, kind: output, shape index: {}]  }
   0x1   :  { %9 = vsyncpa [#allocation6], 0  ;;  %s1659_s12 = smov [#allocation5]  }
   0x2   :  { %s27_s13 = sshll.u32 %s1659_s12, 4  ;;  %s28_s13 = int_to_ptr.vmem [resolvable:$true] %s27_s13 }
   0x3   :  { %s1603_s14 = scalar_lea.vmem %s28_s13, 65536  ;;  %p1608_p1 = scmp.lt.s32.totalorder %s28_s13, %s28_s13 }
   0x4   :  { %p1604_p0 = scmp.ne.s32.totalorder %s28_s13, %s1603_s14  ;;  %p1609_p2 = scmp.lt.s32.totalorder %s1603_s14, %s1603_s14 }
   0x6   :  { %p1610_p3 = por %p1609_p2, %p1608_p1 }
   0x8   :  { %p1611_p4 = pnand %p1610_p3, %p1604_p0 }
   0xa   :  { %1614 = shalt.err (!%p1611_p4)
}
   0xb   :  { %s1660_s15 = smov 1024   ;;  %s1661_s16 = smov 64  }
   0xc   :  { %33 = dma.hbm_to_vmem [thread:$0]  %s1928_s1, 65536, %s28_s13, [#allocation6], %s1660_s15, %s1660_s15, %s1661_s16  }
   0xd   :  { %s1662_s19 = smov [#allocation3]  }
   0xe   :  { %s15_s20 = sshll.u32 %s1662_s19, 4  ;;  %s16_s20 = int_to_ptr.vmem [resolvable:$true] %s15_s20 }
   0xf   :  { %s1623_s21 = scalar_lea.vmem %s16_s20, 2048  ;;  %p1628_p6 = scmp.lt.s32.totalorder %s16_s20, %s16_s20 }
  0x10   :  { %p1624_p5 = scmp.ne.s32.totalorder %s16_s20, %s1623_s21  ;;  %p1629_p7 = scmp.lt.s32.totalorder %s1623_s21, %s1623_s21 }
  0x12   :  { %p1630_p8 = por %p1629_p7, %p1628_p6 }
  0x14   :  { %p1631_p9 = pnand %p1630_p8, %p1624_p5 }
  0x16   :  { %1634 = shalt.err (!%p1631_p9)
}
  0x17   :  { %s1663_s22 = smov 512   ;;  %s1664_s23 = smov 32  }
  0x18   :  { %21 = dma.hbm_to_vmem [thread:$0]  %s1927_s0, 2048, %s16_s20, [#allocation4], %s1663_s22, %s1663_s22, %s1664_s23  }
  0x19   :  { %s1665_s26 = smov [#allocation7]  }
  0x1a   :  { %s40_s27 = sshll.u32 %s1665_s26, 4  ;;  %s41_s27 = int_to_ptr.vmem [resolvable:$true] %s40_s27 }
  0x1b   :  { %s1643_s1 = scalar_lea.vmem %s41_s27, 128  ;;  %p1648_p11 = scmp.lt.s32.totalorder %s41_s27, %s41_s27 }
  0x1c   :  { %p1644_p10 = scmp.ne.s32.totalorder %s41_s27, %s1643_s1  ;;  %p1649_p12 = scmp.lt.s32.totalorder %s1643_s1, %s1643_s1 }
  0x1e   :  { %p1650_p13 = por %p1649_p12, %p1648_p11 }
  0x20   :  { %p1651_p0 = pnand %p1650_p13, %p1644_p10 }
  0x22   :  { %1654 = shalt.err (!%p1651_p0)
}
  0x23   :  { %43 = dma.hbm_to_vmem [thread:$0]  %s1929_s2, 128, %s41_s27, [#allocation6]  }
  0x24   :  { %1655 = dma.done.wait [#allocation4], 2048  }
  0x25   :  { %1656 = vsyncadd [#allocation4], 4294965248 }
  0x26   :  { %1657 = dma.done.wait [#allocation6], 65664  }
  0x27   :  { %1658 = vsyncadd [#allocation6], 4294901632  ;;  %v258_v0 = vld [vmem:[#allocation5 + $0x3c8] sm:$0xff]  ;;  %v257_v2 = vld [vmem:[#allocation5 + $0x3c0] sm:$0xff] }
  0x28   :  { %v514_v1 = vld [vmem:[#allocation5 + $0xbc8] sm:$0xff]  ;;  %649 = vmatprep.subr.mxu0 %v258_v0  ;;  %v513_v3 = vld [vmem:[#allocation5 + $0xbc0] sm:$0xff] }
  0x29   :  { %738 = vmatprep.subr.mxu1 %v514_v1  ;;  %v250_v4 = vld [vmem:[#allocation5 + $0x388] sm:$0xff]  ;;  %650 = vmatpush1.msra.mxu0 %v257_v2  ;;  %v249_v6 = vld [vmem:[#allocation5 + $0x380] sm:$0xff] }
  0x2a   :  { %v506_v5 = vld [vmem:[#allocation5 + $0xb88] sm:$0xff]  ;;  %739 = vmatpush1.msra.mxu1 %v513_v3  ;;  %v505_v7 = vld [vmem:[#allocation5 + $0xb80] sm:$0xff]  ;;  %651 = vmatprep.subr.mxu0 %v250_v4 }
  0x2b   :  { %v242_v8 = vld [vmem:[#allocation5 + $0x348] sm:$0xff]  ;;  %740 = vmatprep.subr.mxu1 %v506_v5  ;;  %v241_v10 = vld [vmem:[#allocation5 + $0x340] sm:$0xff]  ;;  %652 = vmatpush1.msra.mxu0 %v249_v6 }
  0x2c   :  { %v498_v9 = vld [vmem:[#allocation5 + $0xb48] sm:$0xff]  ;;  %v497_v11 = vld [vmem:[#allocation5 + $0xb40] sm:$0xff]  ;;  %741 = vmatpush1.msra.mxu1 %v505_v7  ;;  %653 = vmatprep.subr.mxu0 %v242_v8 }
  0x2d   :  { %v234_v12 = vld [vmem:[#allocation5 + $0x308] sm:$0xff]  ;;  %742 = vmatprep.subr.mxu1 %v498_v9  ;;  %v233_v14 = vld [vmem:[#allocation5 + $0x300] sm:$0xff]  ;;  %654 = vmatpush1.msra.mxu0 %v241_v10 }
  0x2e   :  { %v490_v13 = vld [vmem:[#allocation5 + $0xb08] sm:$0xff]  ;;  %v489_v15 = vld [vmem:[#allocation5 + $0xb00] sm:$0xff]  ;;  %743 = vmatpush1.msra.mxu1 %v497_v11  ;;  %655 = vmatprep.subr.mxu0 %v234_v12 }
  0x2f   :  { %v226_v16 = vld [vmem:[#allocation5 + $0x2c8] sm:$0xff]  ;;  %744 = vmatprep.subr.mxu1 %v490_v13  ;;  %v225_v18 = vld [vmem:[#allocation5 + $0x2c0] sm:$0xff]  ;;  %656 = vmatpush1.msra.mxu0 %v233_v14 }
  0x30   :  { %v482_v17 = vld [vmem:[#allocation5 + $0xac8] sm:$0xff]  ;;  %v481_v19 = vld [vmem:[#allocation5 + $0xac0] sm:$0xff]  ;;  %745 = vmatpush1.msra.mxu1 %v489_v15  ;;  %657 = vmatprep.subr.mxu0 %v226_v16 }
  0x31   :  { %v218_v20 = vld [vmem:[#allocation5 + $0x288] sm:$0xff]  ;;  %746 = vmatprep.subr.mxu1 %v482_v17  ;;  %v217_v22 = vld [vmem:[#allocation5 + $0x280] sm:$0xff]  ;;  %658 = vmatpush1.msra.mxu0 %v225_v18 }
  0x32   :  { %v474_v21 = vld [vmem:[#allocation5 + $0xa88] sm:$0xff]  ;;  %v473_v23 = vld [vmem:[#allocation5 + $0xa80] sm:$0xff]  ;;  %747 = vmatpush1.msra.mxu1 %v481_v19  ;;  %659 = vmatprep.subr.mxu0 %v218_v20 }
  0x33   :  { %v210_v24 = vld [vmem:[#allocation5 + $0x248] sm:$0xff]  ;;  %748 = vmatprep.subr.mxu1 %v474_v21  ;;  %v209_v26 = vld [vmem:[#allocation5 + $0x240] sm:$0xff]  ;;  %660 = vmatpush1.msra.mxu0 %v217_v22 }
  0x34   :  { %v466_v25 = vld [vmem:[#allocation5 + $0xa48] sm:$0xff]  ;;  %v465_v27 = vld [vmem:[#allocation5 + $0xa40] sm:$0xff]  ;;  %749 = vmatpush1.msra.mxu1 %v473_v23  ;;  %661 = vmatprep.subr.mxu0 %v210_v24 }
  0x35   :  { %v202_v28 = vld [vmem:[#allocation5 + $0x208] sm:$0xff]  ;;  %750 = vmatprep.subr.mxu1 %v466_v25  ;;  %v201_v30 = vld [vmem:[#allocation5 + $0x200] sm:$0xff]  ;;  %662 = vmatpush1.msra.mxu0 %v209_v26 }
  0x36   :  { %v458_v29 = vld [vmem:[#allocation5 + $0xa08] sm:$0xff]  ;;  %v457_v31 = vld [vmem:[#allocation5 + $0xa00] sm:$0xff]  ;;  %751 = vmatpush1.msra.mxu1 %v465_v27  ;;  %663 = vmatprep.subr.mxu0 %v202_v28 }
  0x37   :  { %v194_v32 = vld [vmem:[#allocation5 + $0x1c8] sm:$0xff]  ;;  %752 = vmatprep.subr.mxu1 %v458_v29  ;;  %v193_v34 = vld [vmem:[#allocation5 + $0x1c0] sm:$0xff]  ;;  %664 = vmatpush1.msra.mxu0 %v201_v30 }
  0x38   :  { %v450_v33 = vld [vmem:[#allocation5 + $0x9c8] sm:$0xff]  ;;  %v449_v35 = vld [vmem:[#allocation5 + $0x9c0] sm:$0xff]  ;;  %753 = vmatpush1.msra.mxu1 %v457_v31  ;;  %665 = vmatprep.subr.mxu0 %v194_v32 }
  0x39   :  { %v186_v36 = vld [vmem:[#allocation5 + $0x188] sm:$0xff]  ;;  %754 = vmatprep.subr.mxu1 %v450_v33  ;;  %v185_v38 = vld [vmem:[#allocation5 + $0x180] sm:$0xff]  ;;  %666 = vmatpush1.msra.mxu0 %v193_v34 }
  0x3a   :  { %v442_v37 = vld [vmem:[#allocation5 + $0x988] sm:$0xff]  ;;  %v441_v39 = vld [vmem:[#allocation5 + $0x980] sm:$0xff]  ;;  %755 = vmatpush1.msra.mxu1 %v449_v35  ;;  %667 = vmatprep.subr.mxu0 %v186_v36 }
  0x3b   :  { %v178_v40 = vld [vmem:[#allocation5 + $0x148] sm:$0xff]  ;;  %756 = vmatprep.subr.mxu1 %v442_v37  ;;  %v177_v42 = vld [vmem:[#allocation5 + $0x140] sm:$0xff]  ;;  %668 = vmatpush1.msra.mxu0 %v185_v38 }
  0x3c   :  { %v434_v41 = vld [vmem:[#allocation5 + $0x948] sm:$0xff]  ;;  %v433_v43 = vld [vmem:[#allocation5 + $0x940] sm:$0xff]  ;;  %757 = vmatpush1.msra.mxu1 %v441_v39  ;;  %669 = vmatprep.subr.mxu0 %v178_v40 }
  0x3d   :  { %v170_v44 = vld [vmem:[#allocation5 + $0x108] sm:$0xff]  ;;  %758 = vmatprep.subr.mxu1 %v434_v41  ;;  %v169_v46 = vld [vmem:[#allocation5 + $0x100] sm:$0xff]  ;;  %670 = vmatpush1.msra.mxu0 %v177_v42 }
  0x3e   :  { %v426_v45 = vld [vmem:[#allocation5 + $0x908] sm:$0xff]  ;;  %v425_v47 = vld [vmem:[#allocation5 + $0x900] sm:$0xff]  ;;  %759 = vmatpush1.msra.mxu1 %v433_v43  ;;  %671 = vmatprep.subr.mxu0 %v170_v44 }
  0x3f   :  { %v162_v48 = vld [vmem:[#allocation5 + $0xc8] sm:$0xff]  ;;  %760 = vmatprep.subr.mxu1 %v426_v45  ;;  %v161_v50 = vld [vmem:[#allocation5 + $0xc0] sm:$0xff]  ;;  %672 = vmatpush1.msra.mxu0 %v169_v46 }
  0x40   :  { %v418_v49 = vld [vmem:[#allocation5 + $0x8c8] sm:$0xff]  ;;  %v417_v51 = vld [vmem:[#allocation5 + $0x8c0] sm:$0xff]  ;;  %761 = vmatpush1.msra.mxu1 %v425_v47  ;;  %673 = vmatprep.subr.mxu0 %v162_v48 }
  0x41   :  { %v154_v52 = vld [vmem:[#allocation5 + $0x88] sm:$0xff]  ;;  %762 = vmatprep.subr.mxu1 %v418_v49  ;;  %v153_v54 = vld [vmem:[#allocation5 + $0x80] sm:$0xff]  ;;  %674 = vmatpush1.msra.mxu0 %v161_v50 }
  0x42   :  { %v410_v53 = vld [vmem:[#allocation5 + $0x888] sm:$0xff]  ;;  %v409_v55 = vld [vmem:[#allocation5 + $0x880] sm:$0xff]  ;;  %763 = vmatpush1.msra.mxu1 %v417_v51  ;;  %675 = vmatprep.subr.mxu0 %v154_v52 }
  0x43   :  { %v146_v56 = vld [vmem:[#allocation5 + $0x48] sm:$0xff]  ;;  %764 = vmatprep.subr.mxu1 %v410_v53  ;;  %v145_v58 = vld [vmem:[#allocation5 + $0x40] sm:$0xff]  ;;  %676 = vmatpush1.msra.mxu0 %v153_v54 }
  0x44   :  { %v402_v57 = vld [vmem:[#allocation5 + $0x848] sm:$0xff]  ;;  %v401_v59 = vld [vmem:[#allocation5 + $0x840] sm:$0xff]  ;;  %765 = vmatpush1.msra.mxu1 %v409_v55  ;;  %677 = vmatprep.subr.mxu0 %v146_v56 }
  0x45   :  { %v138_v60 = vld [vmem:[#allocation5 + $0x8] sm:$0xff]  ;;  %766 = vmatprep.subr.mxu1 %v402_v57  ;;  %v137_v62 = vld [vmem:[#allocation5] sm:$0xff]  ;;  %678 = vmatpush1.msra.mxu0 %v145_v58 }
  0x46   :  { %v394_v61 = vld [vmem:[#allocation5 + $0x808] sm:$0xff]  ;;  %v393_v63 = vld [vmem:[#allocation5 + $0x800] sm:$0xff]  ;;  %767 = vmatpush1.msra.mxu1 %v401_v59  ;;  %679 = vmatprep.subr.mxu0 %v138_v60 }
  0x47   :  { %v386_v0 = vld [vmem:[#allocation5 + $0x7c8] sm:$0xff]  ;;  %768 = vmatprep.subr.mxu1 %v394_v61  ;;  %v385_v2 = vld [vmem:[#allocation5 + $0x7c0] sm:$0xff]  ;;  %680 = vmatpush1.msra.mxu0 %v137_v62 }
  0x48   :  { %v642_v1 = vld [vmem:[#allocation5 + $0xfc8] sm:$0xff]  ;;  %v641_v3 = vld [vmem:[#allocation5 + $0xfc0] sm:$0xff]  ;;  %769 = vmatpush1.msra.mxu1 %v393_v63  ;;  %681 = vmatprep.subr.mxu0 %v386_v0 }
  0x49   :  { %v378_v4 = vld [vmem:[#allocation5 + $0x788] sm:$0xff]  ;;  %770 = vmatprep.subr.mxu1 %v642_v1  ;;  %v377_v6 = vld [vmem:[#allocation5 + $0x780] sm:$0xff]  ;;  %682 = vmatpush2.msra.mxu0 %v385_v2  ;;  %v1697_v1 = vld [vmem:[#allocation3 + $0x18] sm:$0xff] }
  0x4a   :  { %v634_v5 = vld [vmem:[#allocation5 + $0xf88] sm:$0xff]  ;;  %v633_v7 = vld [vmem:[#allocation5 + $0xf80] sm:$0xff]  ;;  %771 = vmatpush2.msra.mxu1 %v641_v3  ;;  %683 = vmatprep.subr.mxu0 %v378_v4  ;;  %v1701_v3 = vld [vmem:[#allocation3 + $0x10] sm:$0xff] }
  0x4b   :  { %v370_v8 = vld [vmem:[#allocation5 + $0x748] sm:$0xff]  ;;  %772 = vmatprep.subr.mxu1 %v634_v5  ;;  %v369_v10 = vld [vmem:[#allocation5 + $0x740] sm:$0xff]  ;;  %684 = vmatpush2.msra.mxu0 %v377_v6  ;;  %v260_v4 = vld [vmem:[#allocation5 + $0x3d8] sm:$0xff] }
  0x4c   :  { %v626_v9 = vld [vmem:[#allocation5 + $0xf48] sm:$0xff]  ;;  %v625_v11 = vld [vmem:[#allocation5 + $0xf40] sm:$0xff]  ;;  %773 = vmatpush2.msra.mxu1 %v633_v7  ;;  %685 = vmatprep.subr.mxu0 %v370_v8  ;;  %v516_v5 = vld [vmem:[#allocation5 + $0xbd8] sm:$0xff] }
  0x4d   :  { %v362_v12 = vld [vmem:[#allocation5 + $0x708] sm:$0xff]  ;;  %774 = vmatprep.subr.mxu1 %v626_v9  ;;  %v361_v14 = vld [vmem:[#allocation5 + $0x700] sm:$0xff]  ;;  %686 = vmatpush2.msra.mxu0 %v369_v10  ;;  %v259_v6 = vld [vmem:[#allocation5 + $0x3d0] sm:$0xff] }
  0x4e   :  { %v618_v13 = vld [vmem:[#allocation5 + $0xf08] sm:$0xff]  ;;  %v617_v15 = vld [vmem:[#allocation5 + $0xf00] sm:$0xff]  ;;  %775 = vmatpush2.msra.mxu1 %v625_v11  ;;  %687 = vmatprep.subr.mxu0 %v362_v12  ;;  %v515_v7 = vld [vmem:[#allocation5 + $0xbd0] sm:$0xff] }
  0x4f   :  { %v354_v16 = vld [vmem:[#allocation5 + $0x6c8] sm:$0xff]  ;;  %776 = vmatprep.subr.mxu1 %v618_v13  ;;  %v353_v18 = vld [vmem:[#allocation5 + $0x6c0] sm:$0xff]  ;;  %688 = vmatpush2.msra.mxu0 %v361_v14  ;;  %v252_v8 = vld [vmem:[#allocation5 + $0x398] sm:$0xff] }
  0x50   :  { %v610_v17 = vld [vmem:[#allocation5 + $0xec8] sm:$0xff]  ;;  %v609_v19 = vld [vmem:[#allocation5 + $0xec0] sm:$0xff]  ;;  %777 = vmatpush2.msra.mxu1 %v617_v15  ;;  %689 = vmatprep.subr.mxu0 %v354_v16  ;;  %v508_v9 = vld [vmem:[#allocation5 + $0xb98] sm:$0xff] }
  0x51   :  { %v346_v20 = vld [vmem:[#allocation5 + $0x688] sm:$0xff]  ;;  %778 = vmatprep.subr.mxu1 %v610_v17  ;;  %v345_v22 = vld [vmem:[#allocation5 + $0x680] sm:$0xff]  ;;  %690 = vmatpush2.msra.mxu0 %v353_v18  ;;  %v251_v10 = vld [vmem:[#allocation5 + $0x390] sm:$0xff] }
  0x52   :  { %v602_v21 = vld [vmem:[#allocation5 + $0xe88] sm:$0xff]  ;;  %v601_v23 = vld [vmem:[#allocation5 + $0xe80] sm:$0xff]  ;;  %779 = vmatpush2.msra.mxu1 %v609_v19  ;;  %691 = vmatprep.subr.mxu0 %v346_v20  ;;  %v507_v11 = vld [vmem:[#allocation5 + $0xb90] sm:$0xff] }
  0x53   :  { %v338_v24 = vld [vmem:[#allocation5 + $0x648] sm:$0xff]  ;;  %780 = vmatprep.subr.mxu1 %v602_v21  ;;  %v337_v26 = vld [vmem:[#allocation5 + $0x640] sm:$0xff]  ;;  %692 = vmatpush2.msra.mxu0 %v345_v22  ;;  %v244_v12 = vld [vmem:[#allocation5 + $0x358] sm:$0xff] }
  0x54   :  { %v594_v25 = vld [vmem:[#allocation5 + $0xe48] sm:$0xff]  ;;  %v593_v27 = vld [vmem:[#allocation5 + $0xe40] sm:$0xff]  ;;  %781 = vmatpush2.msra.mxu1 %v601_v23  ;;  %693 = vmatprep.subr.mxu0 %v338_v24  ;;  %v500_v13 = vld [vmem:[#allocation5 + $0xb58] sm:$0xff] }
  0x55   :  { %v330_v28 = vld [vmem:[#allocation5 + $0x608] sm:$0xff]  ;;  %782 = vmatprep.subr.mxu1 %v594_v25  ;;  %v329_v30 = vld [vmem:[#allocation5 + $0x600] sm:$0xff]  ;;  %694 = vmatpush2.msra.mxu0 %v337_v26  ;;  %v243_v14 = vld [vmem:[#allocation5 + $0x350] sm:$0xff] }
  0x56   :  { %v586_v29 = vld [vmem:[#allocation5 + $0xe08] sm:$0xff]  ;;  %v585_v31 = vld [vmem:[#allocation5 + $0xe00] sm:$0xff]  ;;  %783 = vmatpush2.msra.mxu1 %v593_v27  ;;  %695 = vmatprep.subr.mxu0 %v330_v28  ;;  %v499_v15 = vld [vmem:[#allocation5 + $0xb50] sm:$0xff] }
  0x57   :  { %v322_v32 = vld [vmem:[#allocation5 + $0x5c8] sm:$0xff]  ;;  %784 = vmatprep.subr.mxu1 %v586_v29  ;;  %v321_v34 = vld [vmem:[#allocation5 + $0x5c0] sm:$0xff]  ;;  %696 = vmatpush2.msra.mxu0 %v329_v30  ;;  %v236_v16 = vld [vmem:[#allocation5 + $0x318] sm:$0xff] }
  0x58   :  { %v578_v33 = vld [vmem:[#allocation5 + $0xdc8] sm:$0xff]  ;;  %v577_v35 = vld [vmem:[#allocation5 + $0xdc0] sm:$0xff]  ;;  %785 = vmatpush2.msra.mxu1 %v585_v31  ;;  %697 = vmatprep.subr.mxu0 %v322_v32  ;;  %v492_v17 = vld [vmem:[#allocation5 + $0xb18] sm:$0xff] }
  0x59   :  { %v314_v36 = vld [vmem:[#allocation5 + $0x588] sm:$0xff]  ;;  %786 = vmatprep.subr.mxu1 %v578_v33  ;;  %v313_v38 = vld [vmem:[#allocation5 + $0x580] sm:$0xff]  ;;  %698 = vmatpush2.msra.mxu0 %v321_v34  ;;  %v235_v18 = vld [vmem:[#allocation5 + $0x310] sm:$0xff] }
  0x5a   :  { %v570_v37 = vld [vmem:[#allocation5 + $0xd88] sm:$0xff]  ;;  %v569_v39 = vld [vmem:[#allocation5 + $0xd80] sm:$0xff]  ;;  %787 = vmatpush2.msra.mxu1 %v577_v35  ;;  %699 = vmatprep.subr.mxu0 %v314_v36  ;;  %v491_v19 = vld [vmem:[#allocation5 + $0xb10] sm:$0xff] }
  0x5b   :  { %v306_v40 = vld [vmem:[#allocation5 + $0x548] sm:$0xff]  ;;  %788 = vmatprep.subr.mxu1 %v570_v37  ;;  %v305_v42 = vld [vmem:[#allocation5 + $0x540] sm:$0xff]  ;;  %700 = vmatpush2.msra.mxu0 %v313_v38  ;;  %v228_v20 = vld [vmem:[#allocation5 + $0x2d8] sm:$0xff] }
  0x5c   :  { %v562_v41 = vld [vmem:[#allocation5 + $0xd48] sm:$0xff]  ;;  %v561_v43 = vld [vmem:[#allocation5 + $0xd40] sm:$0xff]  ;;  %789 = vmatpush2.msra.mxu1 %v569_v39  ;;  %701 = vmatprep.subr.mxu0 %v306_v40  ;;  %v484_v21 = vld [vmem:[#allocation5 + $0xad8] sm:$0xff] }
  0x5d   :  { %v298_v44 = vld [vmem:[#allocation5 + $0x508] sm:$0xff]  ;;  %790 = vmatprep.subr.mxu1 %v562_v41  ;;  %v297_v46 = vld [vmem:[#allocation5 + $0x500] sm:$0xff]  ;;  %702 = vmatpush2.msra.mxu0 %v305_v42  ;;  %v227_v22 = vld [vmem:[#allocation5 + $0x2d0] sm:$0xff] }
  0x5e   :  { %v554_v45 = vld [vmem:[#allocation5 + $0xd08] sm:$0xff]  ;;  %v553_v47 = vld [vmem:[#allocation5 + $0xd00] sm:$0xff]  ;;  %791 = vmatpush2.msra.mxu1 %v561_v43  ;;  %703 = vmatprep.subr.mxu0 %v298_v44  ;;  %v483_v23 = vld [vmem:[#allocation5 + $0xad0] sm:$0xff] }
  0x5f   :  { %v290_v48 = vld [vmem:[#allocation5 + $0x4c8] sm:$0xff]  ;;  %792 = vmatprep.subr.mxu1 %v554_v45  ;;  %v289_v50 = vld [vmem:[#allocation5 + $0x4c0] sm:$0xff]  ;;  %704 = vmatpush2.msra.mxu0 %v297_v46  ;;  %v220_v24 = vld [vmem:[#allocation5 + $0x298] sm:$0xff] }
  0x60   :  { %v546_v49 = vld [vmem:[#allocation5 + $0xcc8] sm:$0xff]  ;;  %v545_v51 = vld [vmem:[#allocation5 + $0xcc0] sm:$0xff]  ;;  %793 = vmatpush2.msra.mxu1 %v553_v47  ;;  %705 = vmatprep.subr.mxu0 %v290_v48  ;;  %v476_v25 = vld [vmem:[#allocation5 + $0xa98] sm:$0xff] }
  0x61   :  { %v282_v52 = vld [vmem:[#allocation5 + $0x488] sm:$0xff]  ;;  %794 = vmatprep.subr.mxu1 %v546_v49  ;;  %v281_v54 = vld [vmem:[#allocation5 + $0x480] sm:$0xff]  ;;  %706 = vmatpush2.msra.mxu0 %v289_v50  ;;  %v219_v26 = vld [vmem:[#allocation5 + $0x290] sm:$0xff] }
  0x62   :  { %v538_v53 = vld [vmem:[#allocation5 + $0xc88] sm:$0xff]  ;;  %v537_v55 = vld [vmem:[#allocation5 + $0xc80] sm:$0xff]  ;;  %795 = vmatpush2.msra.mxu1 %v545_v51  ;;  %707 = vmatprep.subr.mxu0 %v282_v52  ;;  %v475_v27 = vld [vmem:[#allocation5 + $0xa90] sm:$0xff] }
  0x63   :  { %v274_v56 = vld [vmem:[#allocation5 + $0x448] sm:$0xff]  ;;  %796 = vmatprep.subr.mxu1 %v538_v53  ;;  %v273_v58 = vld [vmem:[#allocation5 + $0x440] sm:$0xff]  ;;  %708 = vmatpush2.msra.mxu0 %v281_v54  ;;  %v212_v28 = vld [vmem:[#allocation5 + $0x258] sm:$0xff] }
  0x64   :  { %v530_v57 = vld [vmem:[#allocation5 + $0xc48] sm:$0xff]  ;;  %v529_v59 = vld [vmem:[#allocation5 + $0xc40] sm:$0xff]  ;;  %797 = vmatpush2.msra.mxu1 %v537_v55  ;;  %709 = vmatprep.subr.mxu0 %v274_v56  ;;  %v468_v29 = vld [vmem:[#allocation5 + $0xa58] sm:$0xff] }
  0x65   :  { %v266_v60 = vld [vmem:[#allocation5 + $0x408] sm:$0xff]  ;;  %798 = vmatprep.subr.mxu1 %v530_v57  ;;  %v265_v62 = vld [vmem:[#allocation5 + $0x400] sm:$0xff]  ;;  %710 = vmatpush2.msra.mxu0 %v273_v58  ;;  %v211_v30 = vld [vmem:[#allocation5 + $0x250] sm:$0xff] }
  0x66   :  { %v522_v61 = vld [vmem:[#allocation5 + $0xc08] sm:$0xff]  ;;  %799 = vmatpush2.msra.mxu1 %v529_v59  ;;  %v521_v0 = vld [vmem:[#allocation5 + $0xc00] sm:$0xff]  ;;  %711 = vmatprep.subr.mxu0 %v266_v60  ;;  %v467_v31 = vld [vmem:[#allocation5 + $0xa50] sm:$0xff] }
  0x67   :  { %v1695_v63 = vld [vmem:[#allocation3 + $0x8] sm:$0xff]  ;;  %800 = vmatprep.subr.mxu1 %v522_v61  ;;  %v1699_v2 = vld [vmem:[#allocation3] sm:$0xff]  ;;  %712 = vmatpush2.msra.mxu0 %v265_v62  ;;  %v204_v32 = vld [vmem:[#allocation5 + $0x218] sm:$0xff] }
  0x68   :  { %713 = vmatprep.mubr.f32.mxu0 %v1695_v63  ;;  %801 = vmatpush2.msra.mxu1 %v521_v0  ;;  %v460_v33 = vld [vmem:[#allocation5 + $0xa18] sm:$0xff]  ;;  %v203_v34 = vld [vmem:[#allocation5 + $0x210] sm:$0xff] }
  0x69   :  { %802 = vmatprep.mubr.f32.mxu1 %v1697_v1  ;;  %714 = vmatmul.mubr.f32.vlgmr.msra.gmra.mxu0 %v1699_v2  ;;  %v459_v35 = vld [vmem:[#allocation5 + $0xa10] sm:$0xff]  ;;  %v196_v36 = vld [vmem:[#allocation5 + $0x1d8] sm:$0xff] }
  0x6a   :  { %803 = vmatmul.mubr.f32.vlgmr.msra.gmra.mxu1 %v1701_v3  ;;  %827 = vmatprep.subr.mxu0 %v260_v4  ;;  %v452_v37 = vld [vmem:[#allocation5 + $0x9d8] sm:$0xff]  ;;  %v195_v38 = vld [vmem:[#allocation5 + $0x1d0] sm:$0xff] }
  0x6b   :  { %916 = vmatprep.subr.mxu1 %v516_v5  ;;  %828 = vmatpush1.msra.mxu0 %v259_v6  ;;  %v451_v39 = vld [vmem:[#allocation5 + $0x9d0] sm:$0xff]  ;;  %v188_v40 = vld [vmem:[#allocation5 + $0x198] sm:$0xff] }
  0x6c   :  { %917 = vmatpush1.msra.mxu1 %v515_v7  ;;  %829 = vmatprep.subr.mxu0 %v252_v8  ;;  %v444_v41 = vld [vmem:[#allocation5 + $0x998] sm:$0xff]  ;;  %v187_v42 = vld [vmem:[#allocation5 + $0x190] sm:$0xff] }
  0x6d   :  { %918 = vmatprep.subr.mxu1 %v508_v9  ;;  %830 = vmatpush1.msra.mxu0 %v251_v10  ;;  %v443_v43 = vld [vmem:[#allocation5 + $0x990] sm:$0xff]  ;;  %v180_v44 = vld [vmem:[#allocation5 + $0x158] sm:$0xff] }
  0x6e   :  { %919 = vmatpush1.msra.mxu1 %v507_v11  ;;  %831 = vmatprep.subr.mxu0 %v244_v12  ;;  %v436_v45 = vld [vmem:[#allocation5 + $0x958] sm:$0xff]  ;;  %v179_v46 = vld [vmem:[#allocation5 + $0x150] sm:$0xff] }
  0x6f   :  { %920 = vmatprep.subr.mxu1 %v500_v13  ;;  %832 = vmatpush1.msra.mxu0 %v243_v14  ;;  %v435_v47 = vld [vmem:[#allocation5 + $0x950] sm:$0xff]  ;;  %v172_v48 = vld [vmem:[#allocation5 + $0x118] sm:$0xff] }
  0x70   :  { %921 = vmatpush1.msra.mxu1 %v499_v15  ;;  %833 = vmatprep.subr.mxu0 %v236_v16  ;;  %v428_v49 = vld [vmem:[#allocation5 + $0x918] sm:$0xff]  ;;  %v171_v50 = vld [vmem:[#allocation5 + $0x110] sm:$0xff] }
  0x71   :  { %922 = vmatprep.subr.mxu1 %v492_v17  ;;  %834 = vmatpush1.msra.mxu0 %v235_v18  ;;  %v427_v51 = vld [vmem:[#allocation5 + $0x910] sm:$0xff]  ;;  %v164_v52 = vld [vmem:[#allocation5 + $0xd8] sm:$0xff] }
  0x72   :  { %923 = vmatpush1.msra.mxu1 %v491_v19  ;;  %835 = vmatprep.subr.mxu0 %v228_v20  ;;  %v420_v53 = vld [vmem:[#allocation5 + $0x8d8] sm:$0xff]  ;;  %v163_v54 = vld [vmem:[#allocation5 + $0xd0] sm:$0xff] }
  0x73   :  { %924 = vmatprep.subr.mxu1 %v484_v21  ;;  %836 = vmatpush1.msra.mxu0 %v227_v22  ;;  %v419_v55 = vld [vmem:[#allocation5 + $0x8d0] sm:$0xff]  ;;  %v156_v56 = vld [vmem:[#allocation5 + $0x98] sm:$0xff] }
  0x74   :  { %925 = vmatpush1.msra.mxu1 %v483_v23  ;;  %837 = vmatprep.subr.mxu0 %v220_v24  ;;  %v412_v57 = vld [vmem:[#allocation5 + $0x898] sm:$0xff]  ;;  %v155_v58 = vld [vmem:[#allocation5 + $0x90] sm:$0xff] }
  0x75   :  { %926 = vmatprep.subr.mxu1 %v476_v25  ;;  %838 = vmatpush1.msra.mxu0 %v219_v26  ;;  %v411_v59 = vld [vmem:[#allocation5 + $0x890] sm:$0xff]  ;;  %v148_v60 = vld [vmem:[#allocation5 + $0x58] sm:$0xff] }
  0x76   :  { %927 = vmatpush1.msra.mxu1 %v475_v27  ;;  %839 = vmatprep.subr.mxu0 %v212_v28  ;;  %v404_v61 = vld [vmem:[#allocation5 + $0x858] sm:$0xff]  ;;  %v147_v62 = vld [vmem:[#allocation5 + $0x50] sm:$0xff] }
  0x77   :  { %928 = vmatprep.subr.mxu1 %v468_v29  ;;  %840 = vmatpush1.msra.mxu0 %v211_v30  ;;  %v403_v0 = vld [vmem:[#allocation5 + $0x850] sm:$0xff]  ;;  %v140_v4 = vld [vmem:[#allocation5 + $0x18] sm:$0xff] }
  0x78   :  { %929 = vmatpush1.msra.mxu1 %v467_v31  ;;  %841 = vmatprep.subr.mxu0 %v204_v32  ;;  %v396_v5 = vld [vmem:[#allocation5 + $0x818] sm:$0xff]  ;;  %v139_v6 = vld [vmem:[#allocation5 + $0x10] sm:$0xff] }
  0x79   :  { %930 = vmatprep.subr.mxu1 %v460_v33  ;;  %842 = vmatpush1.msra.mxu0 %v203_v34  ;;  %v395_v7 = vld [vmem:[#allocation5 + $0x810] sm:$0xff]  ;;  %v388_v8 = vld [vmem:[#allocation5 + $0x7d8] sm:$0xff] }
  0x7a   :  { %931 = vmatpush1.msra.mxu1 %v459_v35  ;;  %843 = vmatprep.subr.mxu0 %v196_v36  ;;  %v644_v9 = vld [vmem:[#allocation5 + $0xfd8] sm:$0xff]  ;;  %v387_v10 = vld [vmem:[#allocation5 + $0x7d0] sm:$0xff] }
  0x7b   :  { %932 = vmatprep.subr.mxu1 %v452_v37  ;;  %844 = vmatpush1.msra.mxu0 %v195_v38  ;;  %v643_v11 = vld [vmem:[#allocation5 + $0xfd0] sm:$0xff]  ;;  %v380_v12 = vld [vmem:[#allocation5 + $0x798] sm:$0xff] }
  0x7c   :  { %933 = vmatpush1.msra.mxu1 %v451_v39  ;;  %845 = vmatprep.subr.mxu0 %v188_v40  ;;  %v636_v13 = vld [vmem:[#allocation5 + $0xf98] sm:$0xff]  ;;  %v379_v14 = vld [vmem:[#allocation5 + $0x790] sm:$0xff] }
  0x7d   :  { %934 = vmatprep.subr.mxu1 %v444_v41  ;;  %846 = vmatpush1.msra.mxu0 %v187_v42  ;;  %v635_v15 = vld [vmem:[#allocation5 + $0xf90] sm:$0xff]  ;;  %v372_v16 = vld [vmem:[#allocation5 + $0x758] sm:$0xff] }
  0x7e   :  { %935 = vmatpush1.msra.mxu1 %v443_v43  ;;  %847 = vmatprep.subr.mxu0 %v180_v44  ;;  %v628_v17 = vld [vmem:[#allocation5 + $0xf58] sm:$0xff]  ;;  %v371_v18 = vld [vmem:[#allocation5 + $0x750] sm:$0xff]  ;;  %v1707_v44 = vld [vmem:[#allocation3 + $0x28] sm:$0xff] }
  0x7f   :  { %936 = vmatprep.subr.mxu1 %v436_v45  ;;  %848 = vmatpush1.msra.mxu0 %v179_v46  ;;  %v627_v19 = vld [vmem:[#allocation5 + $0xf50] sm:$0xff]  ;;  %v364_v20 = vld [vmem:[#allocation5 + $0x718] sm:$0xff] }
  0x80   :  { %937 = vmatpush1.msra.mxu1 %v435_v47  ;;  %849 = vmatprep.subr.mxu0 %v172_v48  ;;  %v620_v21 = vld [vmem:[#allocation5 + $0xf18] sm:$0xff]  ;;  %v363_v22 = vld [vmem:[#allocation5 + $0x710] sm:$0xff]  ;;  %v1711_v48 = vld [vmem:[#allocation3 + $0x20] sm:$0xff] }
  0x81   :  { %938 = vmatprep.subr.mxu1 %v428_v49  ;;  %850 = vmatpush1.msra.mxu0 %v171_v50  ;;  %v619_v23 = vld [vmem:[#allocation5 + $0xf10] sm:$0xff]  ;;  %v356_v24 = vld [vmem:[#allocation5 + $0x6d8] sm:$0xff] }
  0x82   :  { %939 = vmatpush1.msra.mxu1 %v427_v51  ;;  %851 = vmatprep.subr.mxu0 %v164_v52  ;;  %v612_v25 = vld [vmem:[#allocation5 + $0xed8] sm:$0xff]  ;;  %v355_v26 = vld [vmem:[#allocation5 + $0x6d0] sm:$0xff] }
  0x83   :  { %940 = vmatprep.subr.mxu1 %v420_v53  ;;  %852 = vmatpush1.msra.mxu0 %v163_v54  ;;  %v611_v27 = vld [vmem:[#allocation5 + $0xed0] sm:$0xff]  ;;  %v348_v28 = vld [vmem:[#allocation5 + $0x698] sm:$0xff] }
  0x84   :  { %941 = vmatpush1.msra.mxu1 %v419_v55  ;;  %853 = vmatprep.subr.mxu0 %v156_v56  ;;  %v604_v29 = vld [vmem:[#allocation5 + $0xe98] sm:$0xff]  ;;  %v347_v30 = vld [vmem:[#allocation5 + $0x690] sm:$0xff]  ;;  %v1719_v56 = vld [vmem:[#allocation3 + $0x48] sm:$0xff] }
  0x85   :  { %942 = vmatprep.subr.mxu1 %v412_v57  ;;  %854 = vmatpush1.msra.mxu0 %v155_v58  ;;  %v603_v31 = vld [vmem:[#allocation5 + $0xe90] sm:$0xff]  ;;  %v340_v32 = vld [vmem:[#allocation5 + $0x658] sm:$0xff] }
  0x86   :  { %943 = vmatpush1.msra.mxu1 %v411_v59  ;;  %855 = vmatprep.subr.mxu0 %v148_v60  ;;  %v596_v33 = vld [vmem:[#allocation5 + $0xe58] sm:$0xff]  ;;  %v339_v34 = vld [vmem:[#allocation5 + $0x650] sm:$0xff]  ;;  %v1723_v60 = vld [vmem:[#allocation3 + $0x40] sm:$0xff] }
  0x87   :  { %944 = vmatprep.subr.mxu1 %v404_v61  ;;  %856 = vmatpush1.msra.mxu0 %v147_v62  ;;  %v595_v35 = vld [vmem:[#allocation5 + $0xe50] sm:$0xff]  ;;  %v332_v36 = vld [vmem:[#allocation5 + $0x618] sm:$0xff] }
  0x88   :  { %945 = vmatpush1.msra.mxu1 %v403_v0  ;;  %857 = vmatprep.subr.mxu0 %v140_v4  ;;  %v588_v37 = vld [vmem:[#allocation5 + $0xe18] sm:$0xff]  ;;  %v331_v38 = vld [vmem:[#allocation5 + $0x610] sm:$0xff] }
  0x89   :  { %946 = vmatprep.subr.mxu1 %v396_v5  ;;  %858 = vmatpush1.msra.mxu0 %v139_v6  ;;  %v587_v39 = vld [vmem:[#allocation5 + $0xe10] sm:$0xff]  ;;  %v324_v40 = vld [vmem:[#allocation5 + $0x5d8] sm:$0xff] }
  0x8a   :  { %947 = vmatpush1.msra.mxu1 %v395_v7  ;;  %859 = vmatprep.subr.mxu0 %v388_v8  ;;  %v580_v41 = vld [vmem:[#allocation5 + $0xdd8] sm:$0xff]  ;;  %v323_v42 = vld [vmem:[#allocation5 + $0x5d0] sm:$0xff]  ;;  %v1731_v8 = vld [vmem:[#allocation3 + $0x68] sm:$0xff] }
  0x8b   :  { %948 = vmatprep.subr.mxu1 %v644_v9  ;;  %860 = vmatpush2.msra.mxu0 %v387_v10  ;;  %v579_v43 = vld [vmem:[#allocation5 + $0xdd0] sm:$0xff]  ;;  %v1709_v45 = vld [vmem:[#allocation3 + $0x38] sm:$0xff] }
  0x8c   :  { %949 = vmatpush2.msra.mxu1 %v643_v11  ;;  %861 = vmatprep.subr.mxu0 %v380_v12  ;;  %v316_v46 = vld [vmem:[#allocation5 + $0x598] sm:$0xff]  ;;  %v1713_v49 = vld [vmem:[#allocation3 + $0x30] sm:$0xff]  ;;  %v1735_v12 = vld [vmem:[#allocation3 + $0x60] sm:$0xff] }
  0x8d   :  { %950 = vmatprep.subr.mxu1 %v636_v13  ;;  %862 = vmatpush2.msra.mxu0 %v379_v14  ;;  %v572_v47 = vld [vmem:[#allocation5 + $0xd98] sm:$0xff]  ;;  %v315_v50 = vld [vmem:[#allocation5 + $0x590] sm:$0xff] }
  0x8e   :  { %951 = vmatpush2.msra.mxu1 %v635_v15  ;;  %863 = vmatprep.subr.mxu0 %v372_v16  ;;  %v571_v51 = vld [vmem:[#allocation5 + $0xd90] sm:$0xff]  ;;  %v308_v52 = vld [vmem:[#allocation5 + $0x558] sm:$0xff] }
  0x8f   :  { %952 = vmatprep.subr.mxu1 %v628_v17  ;;  %864 = vmatpush2.msra.mxu0 %v371_v18  ;;  %v564_v53 = vld [vmem:[#allocation5 + $0xd58] sm:$0xff]  ;;  %v307_v54 = vld [vmem:[#allocation5 + $0x550] sm:$0xff] }
  0x90   :  { %953 = vmatpush2.msra.mxu1 %v627_v19  ;;  %865 = vmatprep.subr.mxu0 %v364_v20  ;;  %v563_v55 = vld [vmem:[#allocation5 + $0xd50] sm:$0xff]  ;;  %v1721_v57 = vld [vmem:[#allocation3 + $0x58] sm:$0xff] }
  0x91   :  { %954 = vmatprep.subr.mxu1 %v620_v21  ;;  %866 = vmatpush2.msra.mxu0 %v363_v22  ;;  %v300_v58 = vld [vmem:[#allocation5 + $0x518] sm:$0xff]  ;;  %v1725_v61 = vld [vmem:[#allocation3 + $0x50] sm:$0xff] }
  0x92   :  { %955 = vmatpush2.msra.mxu1 %v619_v23  ;;  %867 = vmatprep.subr.mxu0 %v356_v24  ;;  %v556_v59 = vld [vmem:[#allocation5 + $0xd18] sm:$0xff]  ;;  %v299_v62 = vld [vmem:[#allocation5 + $0x510] sm:$0xff]  ;;  %v262_v24 = vld [vmem:[#allocation5 + $0x3e8] sm:$0xff] }
  0x93   :  { %956 = vmatprep.subr.mxu1 %v612_v25  ;;  %868 = vmatpush2.msra.mxu0 %v355_v26  ;;  %v555_v0 = vld [vmem:[#allocation5 + $0xd10] sm:$0xff]  ;;  %v292_v4 = vld [vmem:[#allocation5 + $0x4d8] sm:$0xff]  ;;  %v518_v25 = vld [vmem:[#allocation5 + $0xbe8] sm:$0xff] }
  0x94   :  { %957 = vmatpush2.msra.mxu1 %v611_v27  ;;  %869 = vmatprep.subr.mxu0 %v348_v28  ;;  %v548_v5 = vld [vmem:[#allocation5 + $0xcd8] sm:$0xff]  ;;  %v291_v6 = vld [vmem:[#allocation5 + $0x4d0] sm:$0xff]  ;;  %v261_v26 = vld [vmem:[#allocation5 + $0x3e0] sm:$0xff] }
  0x95   :  { %958 = vmatprep.subr.mxu1 %v604_v29  ;;  %870 = vmatpush2.msra.mxu0 %v347_v30  ;;  %v547_v7 = vld [vmem:[#allocation5 + $0xcd0] sm:$0xff]  ;;  %v1733_v9 = vld [vmem:[#allocation3 + $0x78] sm:$0xff]  ;;  %v517_v27 = vld [vmem:[#allocation5 + $0xbe0] sm:$0xff] }
  0x96   :  { %959 = vmatpush2.msra.mxu1 %v603_v31  ;;  %871 = vmatprep.subr.mxu0 %v340_v32  ;;  %v284_v10 = vld [vmem:[#allocation5 + $0x498] sm:$0xff]  ;;  %v1737_v13 = vld [vmem:[#allocation3 + $0x70] sm:$0xff]  ;;  %v254_v28 = vld [vmem:[#allocation5 + $0x3a8] sm:$0xff] }
  0x97   :  { %960 = vmatprep.subr.mxu1 %v596_v33  ;;  %872 = vmatpush2.msra.mxu0 %v339_v34  ;;  %v540_v11 = vld [vmem:[#allocation5 + $0xc98] sm:$0xff]  ;;  %v283_v14 = vld [vmem:[#allocation5 + $0x490] sm:$0xff]  ;;  %v510_v29 = vld [vmem:[#allocation5 + $0xba8] sm:$0xff] }
  0x98   :  { %961 = vmatpush2.msra.mxu1 %v595_v35  ;;  %873 = vmatprep.subr.mxu0 %v332_v36  ;;  %v539_v15 = vld [vmem:[#allocation5 + $0xc90] sm:$0xff]  ;;  %v276_v16 = vld [vmem:[#allocation5 + $0x458] sm:$0xff]  ;;  %v253_v30 = vld [vmem:[#allocation5 + $0x3a0] sm:$0xff] }
  0x99   :  { %962 = vmatprep.subr.mxu1 %v588_v37  ;;  %874 = vmatpush2.msra.mxu0 %v331_v38  ;;  %v532_v17 = vld [vmem:[#allocation5 + $0xc58] sm:$0xff]  ;;  %v275_v18 = vld [vmem:[#allocation5 + $0x450] sm:$0xff]  ;;  %v509_v31 = vld [vmem:[#allocation5 + $0xba0] sm:$0xff] }
  0x9a   :  { %963 = vmatpush2.msra.mxu1 %v587_v39  ;;  %875 = vmatprep.subr.mxu0 %v324_v40  ;;  %v531_v19 = vld [vmem:[#allocation5 + $0xc50] sm:$0xff]  ;;  %v268_v20 = vld [vmem:[#allocation5 + $0x418] sm:$0xff]  ;;  %v502_v32 = vld [vmem:[#allocation5 + $0xb68] sm:$0xff] }
  0x9b   :  { %964 = vmatprep.subr.mxu1 %v580_v41  ;;  %876 = vmatpush2.msra.mxu0 %v323_v42  ;;  %v524_v21 = vld [vmem:[#allocation5 + $0xc18] sm:$0xff]  ;;  %v267_v22 = vld [vmem:[#allocation5 + $0x410] sm:$0xff]  ;;  %v245_v33 = vld [vmem:[#allocation5 + $0x360] sm:$0xff] }
  0x9c   :  { %965 = vmatpush2.msra.mxu1 %v579_v43  ;;  %719 = vmatprep.mubr.f32.mxu0 %v1707_v44  ;;  %v523_v23 = vld [vmem:[#allocation5 + $0xc10] sm:$0xff]  ;;  %v238_v34 = vld [vmem:[#allocation5 + $0x328] sm:$0xff]  ;;  %v493_v35 = vld [vmem:[#allocation5 + $0xb20] sm:$0xff] }
  0x9d   :  { %808 = vmatprep.mubr.f32.mxu1 %v1709_v45  ;;  %877 = vmatprep.subr.mxu0 %v316_v46  ;;  %v230_v36 = vld [vmem:[#allocation5 + $0x2e8] sm:$0xff]  ;;  %v229_v38 = vld [vmem:[#allocation5 + $0x2e0] sm:$0xff] }
  0x9e   :  { %966 = vmatprep.subr.mxu1 %v572_v47  ;;  %720 = vmatmul.mubr.f32.gmra.mxu0 %v1711_v48  ;;  %v486_v37 = vld [vmem:[#allocation5 + $0xae8] sm:$0xff]  ;;  %v485_v39 = vld [vmem:[#allocation5 + $0xae0] sm:$0xff] }
  0x9f   :  { %809 = vmatmul.mubr.f32.gmra.mxu1 %v1713_v49  ;;  %878 = vmatpush2.msra.mxu0 %v315_v50  ;;  %v222_v40 = vld [vmem:[#allocation5 + $0x2a8] sm:$0xff]  ;;  %v221_v42 = vld [vmem:[#allocation5 + $0x2a0] sm:$0xff] }
  0xa0   :  { %967 = vmatpush2.msra.mxu1 %v571_v51  ;;  %879 = vmatprep.subr.mxu0 %v308_v52  ;;  %v478_v41 = vld [vmem:[#allocation5 + $0xaa8] sm:$0xff]  ;;  %v477_v43 = vld [vmem:[#allocation5 + $0xaa0] sm:$0xff] }
  0xa1   :  { %968 = vmatprep.subr.mxu1 %v564_v53  ;;  %880 = vmatpush2.msra.mxu0 %v307_v54  ;;  %v214_v46 = vld [vmem:[#allocation5 + $0x268] sm:$0xff]  ;;  %v213_v50 = vld [vmem:[#allocation5 + $0x260] sm:$0xff] }
  0xa2   :  { %969 = vmatpush2.msra.mxu1 %v563_v55  ;;  %725 = vmatprep.mubr.f32.mxu0 %v1719_v56  ;;  %v470_v47 = vld [vmem:[#allocation5 + $0xa68] sm:$0xff]  ;;  %v469_v51 = vld [vmem:[#allocation5 + $0xa60] sm:$0xff] }
  0xa3   :  { %814 = vmatprep.mubr.f32.mxu1 %v1721_v57  ;;  %881 = vmatprep.subr.mxu0 %v300_v58  ;;  %v206_v52 = vld [vmem:[#allocation5 + $0x228] sm:$0xff]  ;;  %v205_v54 = vld [vmem:[#allocation5 + $0x220] sm:$0xff] }
  0xa4   :  { %970 = vmatprep.subr.mxu1 %v556_v59  ;;  %726 = vmatmul.mubr.f32.gmra.mxu0 %v1723_v60  ;;  %v462_v53 = vld [vmem:[#allocation5 + $0xa28] sm:$0xff]  ;;  %v461_v55 = vld [vmem:[#allocation5 + $0xa20] sm:$0xff] }
  0xa5   :  { %815 = vmatmul.mubr.f32.gmra.mxu1 %v1725_v61  ;;  %882 = vmatpush2.msra.mxu0 %v299_v62  ;;  %v198_v58 = vld [vmem:[#allocation5 + $0x1e8] sm:$0xff]  ;;  %v197_v62 = vld [vmem:[#allocation5 + $0x1e0] sm:$0xff] }
  0xa6   :  { %971 = vmatpush2.msra.mxu1 %v555_v0  ;;  %883 = vmatprep.subr.mxu0 %v292_v4  ;;  %v454_v59 = vld [vmem:[#allocation5 + $0x9e8] sm:$0xff]  ;;  %v453_v0 = vld [vmem:[#allocation5 + $0x9e0] sm:$0xff] }
  0xa7   :  { %972 = vmatprep.subr.mxu1 %v548_v5  ;;  %884 = vmatpush2.msra.mxu0 %v291_v6  ;;  %v190_v4 = vld [vmem:[#allocation5 + $0x1a8] sm:$0xff]  ;;  %v189_v6 = vld [vmem:[#allocation5 + $0x1a0] sm:$0xff] }
  0xa8   :  { %973 = vmatpush2.msra.mxu1 %v547_v7  ;;  %731 = vmatprep.mubr.f32.mxu0 %v1731_v8  ;;  %v446_v5 = vld [vmem:[#allocation5 + $0x9a8] sm:$0xff]  ;;  %v445_v7 = vld [vmem:[#allocation5 + $0x9a0] sm:$0xff] }
  0xa9   :  { %820 = vmatprep.mubr.f32.mxu1 %v1733_v9  ;;  %885 = vmatprep.subr.mxu0 %v284_v10  ;;  %v182_v10 = vld [vmem:[#allocation5 + $0x168] sm:$0xff] }
  0xaa   :  { %974 = vmatprep.subr.mxu1 %v540_v11  ;;  %732 = vmatmul.mubr.f32.gmra.mxu0 %v1735_v12  ;;  %v438_v11 = vld [vmem:[#allocation5 + $0x968] sm:$0xff] }
  0xab   :  { %821 = vmatmul.mubr.f32.gmra.mxu1 %v1737_v13  ;;  %886 = vmatpush2.msra.mxu0 %v283_v14  ;;  %v181_v14 = vld [vmem:[#allocation5 + $0x160] sm:$0xff] }
  0xac   :  { %975 = vmatpush2.msra.mxu1 %v539_v15  ;;  %887 = vmatprep.subr.mxu0 %v276_v16  ;;  %v437_v15 = vld [vmem:[#allocation5 + $0x960] sm:$0xff]  ;;  %v174_v16 = vld [vmem:[#allocation5 + $0x128] sm:$0xff] }
  0xad   :  { %976 = vmatprep.subr.mxu1 %v532_v17  ;;  %888 = vmatpush2.msra.mxu0 %v275_v18  ;;  %v430_v17 = vld [vmem:[#allocation5 + $0x928] sm:$0xff]  ;;  %v173_v18 = vld [vmem:[#allocation5 + $0x120] sm:$0xff] }
  0xae   :  { %977 = vmatpush2.msra.mxu1 %v531_v19  ;;  %889 = vmatprep.subr.mxu0 %v268_v20  ;;  %v429_v19 = vld [vmem:[#allocation5 + $0x920] sm:$0xff]  ;;  %v166_v20 = vld [vmem:[#allocation5 + $0xe8] sm:$0xff] }
  0xaf   :  { %978 = vmatprep.subr.mxu1 %v524_v21  ;;  %890 = vmatpush2.msra.mxu0 %v267_v22  ;;  %v422_v21 = vld [vmem:[#allocation5 + $0x8e8] sm:$0xff]  ;;  %v165_v22 = vld [vmem:[#allocation5 + $0xe0] sm:$0xff] }
  0xb0   :  { %891 = vmatprep.mubr.f32.mxu0 %v1695_v63  ;;  %979 = vmatpush2.msra.mxu1 %v523_v23  ;;  %v246_v63 = vld [vmem:[#allocation5 + $0x368] sm:$0xff]  ;;  %v421_v23 = vld [vmem:[#allocation5 + $0x8e0] sm:$0xff] }
  0xb1   :  { %980 = vmatprep.mubr.f32.mxu1 %v1697_v1  ;;  %892 = vmatmul.mubr.f32.vlgmr.msra.gmra.mxu0 %v1699_v2  ;;  %v501_v1 = vld [vmem:[#allocation5 + $0xb60] sm:$0xff]  ;;  %v494_v2 = vld [vmem:[#allocation5 + $0xb28] sm:$0xff] }
  0xb2   :  { %981 = vmatmul.mubr.f32.vlgmr.msra.gmra.mxu1 %v1701_v3  ;;  %1005 = vmatprep.subr.mxu0 %v262_v24  ;;  %v237_v3 = vld [vmem:[#allocation5 + $0x320] sm:$0xff]  ;;  %v158_v24 = vld [vmem:[#allocation5 + $0xa8] sm:$0xff] }
  0xb3   :  { %1094 = vmatprep.subr.mxu1 %v518_v25  ;;  %1006 = vmatpush1.msra.mxu0 %v261_v26  ;;  %v414_v25 = vld [vmem:[#allocation5 + $0x8a8] sm:$0xff]  ;;  %v157_v26 = vld [vmem:[#allocation5 + $0xa0] sm:$0xff] }
  0xb4   :  { %1095 = vmatpush1.msra.mxu1 %v517_v27  ;;  %1007 = vmatprep.subr.mxu0 %v254_v28  ;;  %v413_v27 = vld [vmem:[#allocation5 + $0x8a0] sm:$0xff]  ;;  %v150_v28 = vld [vmem:[#allocation5 + $0x68] sm:$0xff] }
  0xb5   :  { %1096 = vmatprep.subr.mxu1 %v510_v29  ;;  %1008 = vmatpush1.msra.mxu0 %v253_v30  ;;  %v406_v29 = vld [vmem:[#allocation5 + $0x868] sm:$0xff]  ;;  %v149_v30 = vld [vmem:[#allocation5 + $0x60] sm:$0xff] }
  0xb6   :  { %1097 = vmatpush1.msra.mxu1 %v509_v31  ;;  %1009 = vmatprep.subr.mxu0 %v246_v63  ;;  %v405_v31 = vld [vmem:[#allocation5 + $0x860] sm:$0xff]  ;;  %v142_v63 = vld [vmem:[#allocation5 + $0x28] sm:$0xff] }
  0xb7   :  { %1098 = vmatprep.subr.mxu1 %v502_v32  ;;  %1010 = vmatpush1.msra.mxu0 %v245_v33  ;;  %v398_v32 = vld [vmem:[#allocation5 + $0x828] sm:$0xff]  ;;  %v141_v33 = vld [vmem:[#allocation5 + $0x20] sm:$0xff] }
  0xb8   :  { %1099 = vmatpush1.msra.mxu1 %v501_v1  ;;  %1011 = vmatprep.subr.mxu0 %v238_v34  ;;  %v397_v1 = vld [vmem:[#allocation5 + $0x820] sm:$0xff]  ;;  %v390_v34 = vld [vmem:[#allocation5 + $0x7e8] sm:$0xff] }
  0xb9   :  { %1100 = vmatprep.subr.mxu1 %v494_v2  ;;  %1012 = vmatpush1.msra.mxu0 %v237_v3  ;;  %v646_v2 = vld [vmem:[#allocation5 + $0xfe8] sm:$0xff]  ;;  %v389_v3 = vld [vmem:[#allocation5 + $0x7e0] sm:$0xff] }
  0xba   :  { %1101 = vmatpush1.msra.mxu1 %v493_v35  ;;  %1013 = vmatprep.subr.mxu0 %v230_v36  ;;  %v645_v35 = vld [vmem:[#allocation5 + $0xfe0] sm:$0xff]  ;;  %v382_v36 = vld [vmem:[#allocation5 + $0x7a8] sm:$0xff] }
  0xbb   :  { %1102 = vmatprep.subr.mxu1 %v486_v37  ;;  %1014 = vmatpush1.msra.mxu0 %v229_v38  ;;  %v638_v37 = vld [vmem:[#allocation5 + $0xfa8] sm:$0xff]  ;;  %v381_v38 = vld [vmem:[#allocation5 + $0x7a0] sm:$0xff] }
  0xbc   :  { %1103 = vmatpush1.msra.mxu1 %v485_v39  ;;  %1015 = vmatprep.subr.mxu0 %v222_v40  ;;  %v637_v39 = vld [vmem:[#allocation5 + $0xfa0] sm:$0xff]  ;;  %v374_v40 = vld [vmem:[#allocation5 + $0x768] sm:$0xff] }
  0xbd   :  { %1104 = vmatprep.subr.mxu1 %v478_v41  ;;  %1016 = vmatpush1.msra.mxu0 %v221_v42  ;;  %v630_v41 = vld [vmem:[#allocation5 + $0xf68] sm:$0xff]  ;;  %v373_v42 = vld [vmem:[#allocation5 + $0x760] sm:$0xff] }
  0xbe   :  { %1105 = vmatpush1.msra.mxu1 %v477_v43  ;;  %1017 = vmatprep.subr.mxu0 %v214_v46  ;;  %v629_v43 = vld [vmem:[#allocation5 + $0xf60] sm:$0xff]  ;;  %v366_v46 = vld [vmem:[#allocation5 + $0x728] sm:$0xff] }
  0xbf   :  { %1106 = vmatprep.subr.mxu1 %v470_v47  ;;  %1018 = vmatpush1.msra.mxu0 %v213_v50  ;;  %v622_v47 = vld [vmem:[#allocation5 + $0xf28] sm:$0xff]  ;;  %v365_v50 = vld [vmem:[#allocation5 + $0x720] sm:$0xff] }
  0xc0   :  { %1107 = vmatpush1.msra.mxu1 %v469_v51  ;;  %1019 = vmatprep.subr.mxu0 %v206_v52  ;;  %v621_v51 = vld [vmem:[#allocation5 + $0xf20] sm:$0xff]  ;;  %v358_v52 = vld [vmem:[#allocation5 + $0x6e8] sm:$0xff] }
  0xc1   :  { %1108 = vmatprep.subr.mxu1 %v462_v53  ;;  %1020 = vmatpush1.msra.mxu0 %v205_v54  ;;  %v614_v53 = vld [vmem:[#allocation5 + $0xee8] sm:$0xff]  ;;  %v357_v54 = vld [vmem:[#allocation5 + $0x6e0] sm:$0xff] }
  0xc2   :  { %1109 = vmatpush1.msra.mxu1 %v461_v55  ;;  %1021 = vmatprep.subr.mxu0 %v198_v58  ;;  %v613_v55 = vld [vmem:[#allocation5 + $0xee0] sm:$0xff]  ;;  %v350_v58 = vld [vmem:[#allocation5 + $0x6a8] sm:$0xff] }
  0xc3   :  { %1110 = vmatprep.subr.mxu1 %v454_v59  ;;  %1022 = vmatpush1.msra.mxu0 %v197_v62  ;;  %v606_v59 = vld [vmem:[#allocation5 + $0xea8] sm:$0xff]  ;;  %v349_v62 = vld [vmem:[#allocation5 + $0x6a0] sm:$0xff] }
  0xc4   :  { %1111 = vmatpush1.msra.mxu1 %v453_v0  ;;  %1023 = vmatprep.subr.mxu0 %v190_v4  ;;  %v605_v0 = vld [vmem:[#allocation5 + $0xea0] sm:$0xff]  ;;  %v342_v4 = vld [vmem:[#allocation5 + $0x668] sm:$0xff] }
  0xc5   :  { %1112 = vmatprep.subr.mxu1 %v446_v5  ;;  %1024 = vmatpush1.msra.mxu0 %v189_v6  ;;  %v598_v5 = vld [vmem:[#allocation5 + $0xe68] sm:$0xff]  ;;  %v341_v6 = vld [vmem:[#allocation5 + $0x660] sm:$0xff] }
  0xc6   :  { %1113 = vmatpush1.msra.mxu1 %v445_v7  ;;  %1025 = vmatprep.subr.mxu0 %v182_v10  ;;  %v597_v7 = vld [vmem:[#allocation5 + $0xe60] sm:$0xff]  ;;  %v334_v10 = vld [vmem:[#allocation5 + $0x628] sm:$0xff] }
  0xc7   :  { %1114 = vmatprep.subr.mxu1 %v438_v11  ;;  %1026 = vmatpush1.msra.mxu0 %v181_v14  ;;  %v590_v11 = vld [vmem:[#allocation5 + $0xe28] sm:$0xff]  ;;  %v333_v14 = vld [vmem:[#allocation5 + $0x620] sm:$0xff] }
  0xc8   :  { %1115 = vmatpush1.msra.mxu1 %v437_v15  ;;  %1027 = vmatprep.subr.mxu0 %v174_v16  ;;  %v589_v15 = vld [vmem:[#allocation5 + $0xe20] sm:$0xff]  ;;  %v326_v16 = vld [vmem:[#allocation5 + $0x5e8] sm:$0xff] }
  0xc9   :  { %1116 = vmatprep.subr.mxu1 %v430_v17  ;;  %1028 = vmatpush1.msra.mxu0 %v173_v18  ;;  %v582_v17 = vld [vmem:[#allocation5 + $0xde8] sm:$0xff]  ;;  %v325_v18 = vld [vmem:[#allocation5 + $0x5e0] sm:$0xff] }
  0xca   :  { %1117 = vmatpush1.msra.mxu1 %v429_v19  ;;  %1029 = vmatprep.subr.mxu0 %v166_v20  ;;  %v581_v19 = vld [vmem:[#allocation5 + $0xde0] sm:$0xff]  ;;  %v318_v20 = vld [vmem:[#allocation5 + $0x5a8] sm:$0xff] }
  0xcb   :  { %1118 = vmatprep.subr.mxu1 %v422_v21  ;;  %1030 = vmatpush1.msra.mxu0 %v165_v22  ;;  %v574_v21 = vld [vmem:[#allocation5 + $0xda8] sm:$0xff]  ;;  %v317_v22 = vld [vmem:[#allocation5 + $0x5a0] sm:$0xff] }
  0xcc   :  { %1119 = vmatpush1.msra.mxu1 %v421_v23  ;;  %1031 = vmatprep.subr.mxu0 %v158_v24  ;;  %v573_v23 = vld [vmem:[#allocation5 + $0xda0] sm:$0xff]  ;;  %v310_v24 = vld [vmem:[#allocation5 + $0x568] sm:$0xff] }
  0xcd   :  { %1120 = vmatprep.subr.mxu1 %v414_v25  ;;  %1032 = vmatpush1.msra.mxu0 %v157_v26  ;;  %v566_v25 = vld [vmem:[#allocation5 + $0xd68] sm:$0xff]  ;;  %v309_v26 = vld [vmem:[#allocation5 + $0x560] sm:$0xff] }
  0xce   :  { %1121 = vmatpush1.msra.mxu1 %v413_v27  ;;  %1033 = vmatprep.subr.mxu0 %v150_v28  ;;  %v565_v27 = vld [vmem:[#allocation5 + $0xd60] sm:$0xff]  ;;  %v302_v28 = vld [vmem:[#allocation5 + $0x528] sm:$0xff] }
  0xcf   :  { %1122 = vmatprep.subr.mxu1 %v406_v29  ;;  %1034 = vmatpush1.msra.mxu0 %v149_v30  ;;  %v557_v29 = vld [vmem:[#allocation5 + $0xd20] sm:$0xff] }
  0xd0   :  { %1123 = vmatpush1.msra.mxu1 %v405_v31  ;;  %1035 = vmatprep.subr.mxu0 %v142_v63  ;;  %v293_v30 = vld [vmem:[#allocation5 + $0x4e0] sm:$0xff]  ;;  %v286_v63 = vld [vmem:[#allocation5 + $0x4a8] sm:$0xff] }
  0xd1   :  { %1124 = vmatprep.subr.mxu1 %v398_v32  ;;  %1036 = vmatpush1.msra.mxu0 %v141_v33  ;;  %v549_v31 = vld [vmem:[#allocation5 + $0xce0] sm:$0xff] }
  0xd2   :  { %1125 = vmatpush1.msra.mxu1 %v397_v1  ;;  %1037 = vmatprep.subr.mxu0 %v390_v34  ;;  %v541_v32 = vld [vmem:[#allocation5 + $0xca0] sm:$0xff]  ;;  %v270_v34 = vld [vmem:[#allocation5 + $0x428] sm:$0xff] }
  0xd3   :  { %1126 = vmatprep.subr.mxu1 %v646_v2  ;;  %1038 = vmatpush2.msra.mxu0 %v389_v3  ;;  %v277_v33 = vld [vmem:[#allocation5 + $0x460] sm:$0xff]  ;;  %v526_v2 = vld [vmem:[#allocation5 + $0xc28] sm:$0xff] }
  0xd4   :  { %1127 = vmatpush2.msra.mxu1 %v645_v35  ;;  %1039 = vmatprep.subr.mxu0 %v382_v36  ;;  %v533_v1 = vld [vmem:[#allocation5 + $0xc60] sm:$0xff]  ;;  %v1759_v3 = vld [vmem:[#allocation3 + $0x8] sm:$0xff]  ;;  %v1762_v35 = vld [vmem:[#allocation3 + $0x18] sm:$0xff] }
  0xd5   :  { %1128 = vmatprep.subr.mxu1 %v638_v37  ;;  %1040 = vmatpush2.msra.mxu0 %v381_v38  ;;  %v263_v36 = vld [vmem:[#allocation5 + $0x3f0] sm:$0xff]  ;;  %v1765_v38 = vld [vmem:[#allocation3] sm:$0xff] }
  0xd6   :  { %1129 = vmatpush2.msra.mxu1 %v637_v39  ;;  %1041 = vmatprep.subr.mxu0 %v374_v40  ;;  %v519_v37 = vld [vmem:[#allocation5 + $0xbf0] sm:$0xff]  ;;  %v256_v40 = vld [vmem:[#allocation5 + $0x3b8] sm:$0xff] }
  0xd7   :  { %1130 = vmatprep.subr.mxu1 %v630_v41  ;;  %1042 = vmatpush2.msra.mxu0 %v373_v42  ;;  %v1768_v39 = vld [vmem:[#allocation3 + $0x10] sm:$0xff]  ;;  %v512_v41 = vld [vmem:[#allocation5 + $0xbb8] sm:$0xff] }
  0xd8   :  { %1131 = vmatpush2.msra.mxu1 %v629_v43  ;;  %1043 = vmatprep.subr.mxu0 %v366_v46  ;;  %v255_v42 = vld [vmem:[#allocation5 + $0x3b0] sm:$0xff]  ;;  %v248_v46 = vld [vmem:[#allocation5 + $0x378] sm:$0xff] }
  0xd9   :  { %1132 = vmatprep.subr.mxu1 %v622_v47  ;;  %1044 = vmatpush2.msra.mxu0 %v365_v50  ;;  %v511_v43 = vld [vmem:[#allocation5 + $0xbb0] sm:$0xff]  ;;  %v504_v47 = vld [vmem:[#allocation5 + $0xb78] sm:$0xff] }
  0xda   :  { %1133 = vmatpush2.msra.mxu1 %v621_v51  ;;  %1045 = vmatprep.subr.mxu0 %v358_v52  ;;  %v247_v50 = vld [vmem:[#allocation5 + $0x370] sm:$0xff]  ;;  %v240_v52 = vld [vmem:[#allocation5 + $0x338] sm:$0xff] }
  0xdb   :  { %1134 = vmatprep.subr.mxu1 %v614_v53  ;;  %1046 = vmatpush2.msra.mxu0 %v357_v54  ;;  %v503_v51 = vld [vmem:[#allocation5 + $0xb70] sm:$0xff]  ;;  %v496_v53 = vld [vmem:[#allocation5 + $0xb38] sm:$0xff] }
  0xdc   :  { %1135 = vmatpush2.msra.mxu1 %v613_v55  ;;  %1047 = vmatprep.subr.mxu0 %v350_v58  ;;  %v239_v54 = vld [vmem:[#allocation5 + $0x330] sm:$0xff]  ;;  %v232_v58 = vld [vmem:[#allocation5 + $0x2f8] sm:$0xff] }
  0xdd   :  { %1136 = vmatprep.subr.mxu1 %v606_v59  ;;  %1048 = vmatpush2.msra.mxu0 %v349_v62  ;;  %v495_v55 = vld [vmem:[#allocation5 + $0xb30] sm:$0xff]  ;;  %v488_v59 = vld [vmem:[#allocation5 + $0xaf8] sm:$0xff] }
  0xde   :  { %1137 = vmatpush2.msra.mxu1 %v605_v0  ;;  %1049 = vmatprep.subr.mxu0 %v342_v4  ;;  %v231_v62 = vld [vmem:[#allocation5 + $0x2f0] sm:$0xff]  ;;  %v224_v4 = vld [vmem:[#allocation5 + $0x2b8] sm:$0xff] }
  0xdf   :  { %1138 = vmatprep.subr.mxu1 %v598_v5  ;;  %1050 = vmatpush2.msra.mxu0 %v341_v6  ;;  %v487_v0 = vld [vmem:[#allocation5 + $0xaf0] sm:$0xff]  ;;  %v480_v5 = vld [vmem:[#allocation5 + $0xab8] sm:$0xff] }
  0xe0   :  { %1139 = vmatpush2.msra.mxu1 %v597_v7  ;;  %1051 = vmatprep.subr.mxu0 %v334_v10  ;;  %v223_v6 = vld [vmem:[#allocation5 + $0x2b0] sm:$0xff]  ;;  %v216_v10 = vld [vmem:[#allocation5 + $0x278] sm:$0xff] }
  0xe1   :  { %1140 = vmatprep.subr.mxu1 %v590_v11  ;;  %1052 = vmatpush2.msra.mxu0 %v333_v14  ;;  %v479_v7 = vld [vmem:[#allocation5 + $0xab0] sm:$0xff]  ;;  %v472_v11 = vld [vmem:[#allocation5 + $0xa78] sm:$0xff] }
  0xe2   :  { %1141 = vmatpush2.msra.mxu1 %v589_v15  ;;  %1053 = vmatprep.subr.mxu0 %v326_v16  ;;  %v215_v14 = vld [vmem:[#allocation5 + $0x270] sm:$0xff]  ;;  %v208_v16 = vld [vmem:[#allocation5 + $0x238] sm:$0xff] }
  0xe3   :  { %1142 = vmatprep.subr.mxu1 %v582_v17  ;;  %1054 = vmatpush2.msra.mxu0 %v325_v18  ;;  %v471_v15 = vld [vmem:[#allocation5 + $0xa70] sm:$0xff]  ;;  %v464_v17 = vld [vmem:[#allocation5 + $0xa38] sm:$0xff] }
  0xe4   :  { %1143 = vmatpush2.msra.mxu1 %v581_v19  ;;  %897 = vmatprep.mubr.f32.mxu0 %v1707_v44  ;;  %v558_v44 = vld [vmem:[#allocation5 + $0xd28] sm:$0xff]  ;;  %v207_v18 = vld [vmem:[#allocation5 + $0x230] sm:$0xff] }
  0xe5   :  { %986 = vmatprep.mubr.f32.mxu1 %v1709_v45  ;;  %1055 = vmatprep.subr.mxu0 %v318_v20  ;;  %v301_v45 = vld [vmem:[#allocation5 + $0x520] sm:$0xff]  ;;  %v463_v19 = vld [vmem:[#allocation5 + $0xa30] sm:$0xff]  ;;  %v200_v20 = vld [vmem:[#allocation5 + $0x1f8] sm:$0xff] }
  0xe6   :  { %1144 = vmatprep.subr.mxu1 %v574_v21  ;;  %898 = vmatmul.mubr.f32.gmra.mxu0 %v1711_v48  ;;  %v294_v48 = vld [vmem:[#allocation5 + $0x4e8] sm:$0xff]  ;;  %v456_v21 = vld [vmem:[#allocation5 + $0x9f8] sm:$0xff] }
  0xe7   :  { %987 = vmatmul.mubr.f32.gmra.mxu1 %v1713_v49  ;;  %1056 = vmatpush2.msra.mxu0 %v317_v22  ;;  %v550_v49 = vld [vmem:[#allocation5 + $0xce8] sm:$0xff]  ;;  %v199_v22 = vld [vmem:[#allocation5 + $0x1f0] sm:$0xff] }
  0xe8   :  { %1145 = vmatpush2.msra.mxu1 %v573_v23  ;;  %1057 = vmatprep.subr.mxu0 %v310_v24  ;;  %v455_v23 = vld [vmem:[#allocation5 + $0x9f0] sm:$0xff]  ;;  %v192_v24 = vld [vmem:[#allocation5 + $0x1b8] sm:$0xff] }
  0xe9   :  { %1146 = vmatprep.subr.mxu1 %v566_v25  ;;  %1058 = vmatpush2.msra.mxu0 %v309_v26  ;;  %v448_v25 = vld [vmem:[#allocation5 + $0x9b8] sm:$0xff]  ;;  %v191_v26 = vld [vmem:[#allocation5 + $0x1b0] sm:$0xff] }
  0xea   :  { %1147 = vmatpush2.msra.mxu1 %v565_v27  ;;  %903 = vmatprep.mubr.f32.mxu0 %v1719_v56  ;;  %v542_v56 = vld [vmem:[#allocation5 + $0xca8] sm:$0xff]  ;;  %v447_v27 = vld [vmem:[#allocation5 + $0x9b0] sm:$0xff] }
  0xeb   :  { %992 = vmatprep.mubr.f32.mxu1 %v1721_v57  ;;  %1059 = vmatprep.subr.mxu0 %v302_v28  ;;  %v285_v57 = vld [vmem:[#allocation5 + $0x4a0] sm:$0xff]  ;;  %v184_v28 = vld [vmem:[#allocation5 + $0x178] sm:$0xff] }
  0xec   :  { %1148 = vmatprep.subr.mxu1 %v558_v44  ;;  %904 = vmatmul.mubr.f32.gmra.mxu0 %v1723_v60  ;;  %v278_v60 = vld [vmem:[#allocation5 + $0x468] sm:$0xff]  ;;  %v440_v44 = vld [vmem:[#allocation5 + $0x978] sm:$0xff] }
  0xed   :  { %993 = vmatmul.mubr.f32.gmra.mxu1 %v1725_v61  ;;  %1060 = vmatpush2.msra.mxu0 %v301_v45  ;;  %v534_v61 = vld [vmem:[#allocation5 + $0xc68] sm:$0xff]  ;;  %v183_v45 = vld [vmem:[#allocation5 + $0x170] sm:$0xff] }
  0xee   :  { %1149 = vmatpush2.msra.mxu1 %v557_v29  ;;  %1061 = vmatprep.subr.mxu0 %v294_v48  ;;  %v439_v29 = vld [vmem:[#allocation5 + $0x970] sm:$0xff]  ;;  %v176_v48 = vld [vmem:[#allocation5 + $0x138] sm:$0xff] }
  0xef   :  { %1150 = vmatprep.subr.mxu1 %v550_v49  ;;  %1062 = vmatpush2.msra.mxu0 %v293_v30  ;;  %v432_v49 = vld [vmem:[#allocation5 + $0x938] sm:$0xff]  ;;  %v175_v30 = vld [vmem:[#allocation5 + $0x130] sm:$0xff] }
  0xf0   :  { %1151 = vmatpush2.msra.mxu1 %v549_v31  ;;  %909 = vmatprep.mubr.f32.mxu0 %v1731_v8  ;;  %v269_v8 = vld [vmem:[#allocation5 + $0x420] sm:$0xff]  ;;  %v431_v31 = vld [vmem:[#allocation5 + $0x930] sm:$0xff] }
  0xf1   :  { %998 = vmatprep.mubr.f32.mxu1 %v1733_v9  ;;  %1063 = vmatprep.subr.mxu0 %v286_v63  ;;  %v525_v9 = vld [vmem:[#allocation5 + $0xc20] sm:$0xff]  ;;  %v168_v63 = vld [vmem:[#allocation5 + $0xf8] sm:$0xff] }
  0xf2   :  { %1152 = vmatprep.subr.mxu1 %v542_v56  ;;  %910 = vmatmul.mubr.f32.gmra.mxu0 %v1735_v12  ;;  %v264_v12 = vld [vmem:[#allocation5 + $0x3f8] sm:$0xff] }
  0xf3   :  { %999 = vmatmul.mubr.f32.gmra.mxu1 %v1737_v13  ;;  %1064 = vmatpush2.msra.mxu0 %v285_v57  ;;  %v520_v13 = vld [vmem:[#allocation5 + $0xbf8] sm:$0xff]  ;;  %v167_v57 = vld [vmem:[#allocation5 + $0xf0] sm:$0xff] }
  0xf4   :  { %1153 = vmatpush2.msra.mxu1 %v541_v32  ;;  %1065 = vmatprep.subr.mxu0 %v278_v60  ;;  %v424_v56 = vld [vmem:[#allocation5 + $0x8f8] sm:$0xff]  ;;  %v423_v32 = vld [vmem:[#allocation5 + $0x8f0] sm:$0xff] }
  0xf5   :  { %1154 = vmatprep.subr.mxu1 %v534_v61  ;;  %1066 = vmatpush2.msra.mxu0 %v277_v33  ;;  %v160_v60 = vld [vmem:[#allocation5 + $0xb8] sm:$0xff]  ;;  %v159_v33 = vld [vmem:[#allocation5 + $0xb0] sm:$0xff] }
  0xf6   :  { %1155 = vmatpush2.msra.mxu1 %v533_v1  ;;  %1067 = vmatprep.subr.mxu0 %v270_v34  ;;  %v416_v61 = vld [vmem:[#allocation5 + $0x8b8] sm:$0xff]  ;;  %v415_v1 = vld [vmem:[#allocation5 + $0x8b0] sm:$0xff] }
  0xf7   :  { %1156 = vmatprep.subr.mxu1 %v526_v2  ;;  %1068 = vmatpush2.msra.mxu0 %v269_v8  ;;  %v152_v34 = vld [vmem:[#allocation5 + $0x78] sm:$0xff]  ;;  %v151_v8 = vld [vmem:[#allocation5 + $0x70] sm:$0xff] }
  0xf8   :  { %1069 = vmatprep.mubr.f32.mxu0 %v1759_v3  ;;  %1157 = vmatpush2.msra.mxu1 %v525_v9  ;;  %v408_v2 = vld [vmem:[#allocation5 + $0x878] sm:$0xff]  ;;  %v407_v9 = vld [vmem:[#allocation5 + $0x870] sm:$0xff] }
  0xf9   :  { %1158 = vmatprep.mubr.f32.mxu1 %v1762_v35  ;;  %1070 = vmatmul.mubr.f32.vlgmr.msra.gmra.mxu0 %v1765_v38 }
  0xfa   :  { %1159 = vmatmul.mubr.f32.vlgmr.msra.gmra.mxu1 %v1768_v39  ;;  %1183 = vmatprep.subr.mxu0 %v264_v12  ;;  %v144_v12 = vld [vmem:[#allocation5 + $0x38] sm:$0xff] }
  0xfb   :  { %1272 = vmatprep.subr.mxu1 %v520_v13  ;;  %1184 = vmatpush1.msra.mxu0 %v263_v36  ;;  %v400_v13 = vld [vmem:[#allocation5 + $0x838] sm:$0xff]  ;;  %v143_v36 = vld [vmem:[#allocation5 + $0x30] sm:$0xff] }
  0xfc   :  { %1273 = vmatpush1.msra.mxu1 %v519_v37  ;;  %1185 = vmatprep.subr.mxu0 %v256_v40  ;;  %v399_v37 = vld [vmem:[#allocation5 + $0x830] sm:$0xff]  ;;  %v392_v40 = vld [vmem:[#allocation5 + $0x7f8] sm:$0xff] }
  0xfd   :  { %1274 = vmatprep.subr.mxu1 %v512_v41  ;;  %1186 = vmatpush1.msra.mxu0 %v255_v42  ;;  %v648_v41 = vld [vmem:[#allocation5 + $0xff8] sm:$0xff]  ;;  %v391_v42 = vld [vmem:[#allocation5 + $0x7f0] sm:$0xff] }
  0xfe   :  { %1275 = vmatpush1.msra.mxu1 %v511_v43  ;;  %1187 = vmatprep.subr.mxu0 %v248_v46  ;;  %v647_v43 = vld [vmem:[#allocation5 + $0xff0] sm:$0xff]  ;;  %v384_v46 = vld [vmem:[#allocation5 + $0x7b8] sm:$0xff] }
  0xff   :  { %1276 = vmatprep.subr.mxu1 %v504_v47  ;;  %1188 = vmatpush1.msra.mxu0 %v247_v50  ;;  %v640_v47 = vld [vmem:[#allocation5 + $0xfb8] sm:$0xff]  ;;  %v383_v50 = vld [vmem:[#allocation5 + $0x7b0] sm:$0xff] }
 0x100   :  { %1277 = vmatpush1.msra.mxu1 %v503_v51  ;;  %1189 = vmatprep.subr.mxu0 %v240_v52  ;;  %v639_v51 = vld [vmem:[#allocation5 + $0xfb0] sm:$0xff]  ;;  %v376_v52 = vld [vmem:[#allocation5 + $0x778] sm:$0xff] }
 0x101   :  { %1278 = vmatprep.subr.mxu1 %v496_v53  ;;  %1190 = vmatpush1.msra.mxu0 %v239_v54  ;;  %v632_v53 = vld [vmem:[#allocation5 + $0xf78] sm:$0xff]  ;;  %v375_v54 = vld [vmem:[#allocation5 + $0x770] sm:$0xff] }
 0x102   :  { %1279 = vmatpush1.msra.mxu1 %v495_v55  ;;  %1191 = vmatprep.subr.mxu0 %v232_v58  ;;  %v631_v55 = vld [vmem:[#allocation5 + $0xf70] sm:$0xff]  ;;  %v1462_v58 = vlaneseq }
 0x103   :  { %1280 = vmatprep.subr.mxu1 %v488_v59  ;;  %1192 = vmatpush1.msra.mxu0 %v231_v62  ;;  %v368_v59 = vld [vmem:[#allocation5 + $0x738] sm:$0xff] }
 0x104   :  { %1281 = vmatpush1.msra.mxu1 %v487_v0  ;;  %1193 = vmatprep.subr.mxu0 %v224_v4  ;;  %v624_v62 = vld [vmem:[#allocation5 + $0xf38] sm:$0xff]  ;;  %v367_v0 = vld [vmem:[#allocation5 + $0x730] sm:$0xff] }
 0x105   :  { %1282 = vmatprep.subr.mxu1 %v480_v5  ;;  %1194 = vmatpush1.msra.mxu0 %v223_v6  ;;  %v623_v4 = vld [vmem:[#allocation5 + $0xf30] sm:$0xff]  ;;  %v360_v5 = vld [vmem:[#allocation5 + $0x6f8] sm:$0xff] }
 0x106   :  { %1283 = vmatpush1.msra.mxu1 %v479_v7  ;;  %1195 = vmatprep.subr.mxu0 %v216_v10  ;;  %v616_v6 = vld [vmem:[#allocation5 + $0xef8] sm:$0xff]  ;;  %v359_v7 = vld [vmem:[#allocation5 + $0x6f0] sm:$0xff] }
 0x107   :  { %1284 = vmatprep.subr.mxu1 %v472_v11  ;;  %1196 = vmatpush1.msra.mxu0 %v215_v14  ;;  %v615_v10 = vld [vmem:[#allocation5 + $0xef0] sm:$0xff]  ;;  %v1771_v11 = vshrl.u32 %v1462_v58, 7  ;;  %v352_v14 = vld [vmem:[#allocation5 + $0x6b8] sm:$0xff] }
 0x108   :  { %1285 = vmatpush1.msra.mxu1 %v471_v15  ;;  %1197 = vmatprep.subr.mxu0 %v208_v16  ;;  %v608_v15 = vld [vmem:[#allocation5 + $0xeb8] sm:$0xff]  ;;  %v351_v16 = vld [vmem:[#allocation5 + $0x6b0] sm:$0xff] }
 0x109   :  { %1286 = vmatprep.subr.mxu1 %v464_v17  ;;  %1198 = vmatpush1.msra.mxu0 %v207_v18  ;;  %v607_v17 = vld [vmem:[#allocation5 + $0xeb0] sm:$0xff]  ;;  %v344_v18 = vld [vmem:[#allocation5 + $0x678] sm:$0xff] }
 0x10a   :  { %1287 = vmatpush1.msra.mxu1 %v463_v19  ;;  %1199 = vmatprep.subr.mxu0 %v200_v20  ;;  %v600_v19 = vld [vmem:[#allocation5 + $0xe78] sm:$0xff]  ;;  %v343_v20 = vld [vmem:[#allocation5 + $0x670] sm:$0xff] }
 0x10b   :  { %1288 = vmatprep.subr.mxu1 %v456_v21  ;;  %1200 = vmatpush1.msra.mxu0 %v199_v22  ;;  %v599_v21 = vld [vmem:[#allocation5 + $0xe70] sm:$0xff]  ;;  %v1464_v22 = vsub.s32 0, %v1771_v11  ;;  %v552_v58 = vld [vmem:[#allocation5 + $0xcf8] sm:$0xff] }
 0x10c   :  { %1289 = vmatpush1.msra.mxu1 %v455_v23  ;;  %1201 = vmatprep.subr.mxu0 %v192_v24  ;;  %v336_v23 = vld [vmem:[#allocation5 + $0x638] sm:$0xff] }
 0x10d   :  { %1290 = vmatprep.subr.mxu1 %v448_v25  ;;  %1202 = vmatpush1.msra.mxu0 %v191_v26  ;;  %v592_v24 = vld [vmem:[#allocation5 + $0xe38] sm:$0xff]  ;;  %v1774_v25 = vld [vmem:[#allocation7] sm:$0xff]  ;;  %v335_v26 = vld [vmem:[#allocation5 + $0x630] sm:$0xff] }
 0x10e   :  { %1291 = vmatpush1.msra.mxu1 %v447_v27  ;;  %1203 = vmatprep.subr.mxu0 %v184_v28  ;;  %v591_v27 = vld [vmem:[#allocation5 + $0xe30] sm:$0xff]  ;;  %v1468_v28 = vsub.s32 1, %v1771_v11 }
 0x10f   :  { %1292 = vmatprep.subr.mxu1 %v440_v44  ;;  %1204 = vmatpush1.msra.mxu0 %v183_v45  ;;  %v328_v44 = vld [vmem:[#allocation5 + $0x5f8] sm:$0xff] }
 0x110   :  { %1293 = vmatpush1.msra.mxu1 %v439_v29  ;;  %1205 = vmatprep.subr.mxu0 %v176_v48  ;;  %v584_v45 = vld [vmem:[#allocation5 + $0xdf8] sm:$0xff]  ;;  %v1778_v29 = vrot.slane %v1774_v25, %v1464_v22  ;;  %v327_v48 = vld [vmem:[#allocation5 + $0x5f0] sm:$0xff] }
 0x111   :  { %1294 = vmatprep.subr.mxu1 %v432_v49  ;;  %1206 = vmatpush1.msra.mxu0 %v175_v30  ;;  %v583_v49 = vld [vmem:[#allocation5 + $0xdf0] sm:$0xff] }
 0x112   :  { %1295 = vmatpush1.msra.mxu1 %v431_v31  ;;  %1207 = vmatprep.subr.mxu0 %v168_v63  ;;  %v271_v22 = vld [vmem:[#allocation5 + $0x430] sm:$0xff] }
 0x113   :  { %1296 = vmatprep.subr.mxu1 %v424_v56  ;;  %1208 = vmatpush1.msra.mxu0 %v167_v57  ;;  %v1781_v56 = vrot.slane %v1774_v25, %v1468_v28  ;;  %v1783_v57 = vld [vmem:[#allocation3 + $0x28] sm:$0xff] }
 0x114   :  { %1297 = vmatpush1.msra.mxu1 %v423_v32  ;;  %1209 = vmatprep.subr.mxu0 %v160_v60  ;;  %v1786_v32 = vld [vmem:[#allocation3 + $0x38] sm:$0xff] }
 0x115   :  { %1298 = vmatprep.subr.mxu1 %v416_v61  ;;  %1210 = vmatpush1.msra.mxu0 %v159_v33  ;;  %v320_v60 = vld [vmem:[#allocation5 + $0x5b8] sm:$0xff] }
 0x116   :  { %1299 = vmatpush1.msra.mxu1 %v415_v1  ;;  %1211 = vmatprep.subr.mxu0 %v152_v34  ;;  %v576_v61 = vld [vmem:[#allocation5 + $0xdb8] sm:$0xff]  ;;  %v319_v34 = vld [vmem:[#allocation5 + $0x5b0] sm:$0xff] }
 0x117   :  { %1300 = vmatprep.subr.mxu1 %v408_v2  ;;  %1212 = vmatpush1.msra.mxu0 %v151_v8  ;;  %v575_v2 = vld [vmem:[#allocation5 + $0xdb0] sm:$0xff] }
 0x118   :  { %1301 = vmatpush1.msra.mxu1 %v407_v9  ;;  %1213 = vmatprep.subr.mxu0 %v144_v12  ;;  %v1790_v12 = vld [vmem:[#allocation3 + $0x20] sm:$0xff] }
 0x119   :  { %1302 = vmatprep.subr.mxu1 %v400_v13  ;;  %1214 = vmatpush1.msra.mxu0 %v143_v36  ;;  %v1793_v13 = vld [vmem:[#allocation3 + $0x30] sm:$0xff]  ;;  %v312_v36 = vld [vmem:[#allocation5 + $0x578] sm:$0xff] }
 0x11a   :  { %1303 = vmatpush1.msra.mxu1 %v399_v37  ;;  %1215 = vmatprep.subr.mxu0 %v392_v40  ;;  %v568_v37 = vld [vmem:[#allocation5 + $0xd78] sm:$0xff] }
 0x11b   :  { %1304 = vmatprep.subr.mxu1 %v648_v41  ;;  %1216 = vmatpush2.msra.mxu0 %v391_v42  ;;  %v311_v41 = vld [vmem:[#allocation5 + $0x570] sm:$0xff] }
 0x11c   :  { %1305 = vmatpush2.msra.mxu1 %v647_v43  ;;  %1217 = vmatprep.subr.mxu0 %v384_v46  ;;  %v567_v42 = vld [vmem:[#allocation5 + $0xd70] sm:$0xff]  ;;  %v1803_v43 = vld [vmem:[#allocation3 + $0x48] sm:$0xff]  ;;  %v1806_v46 = vld [vmem:[#allocation3 + $0x58] sm:$0xff] }
 0x11d   :  { %1306 = vmatprep.subr.mxu1 %v640_v47  ;;  %1218 = vmatpush2.msra.mxu0 %v383_v50  ;;  %v304_v47 = vld [vmem:[#allocation5 + $0x538] sm:$0xff] }
 0x11e   :  { %1307 = vmatpush2.msra.mxu1 %v639_v51  ;;  %1219 = vmatprep.subr.mxu0 %v376_v52  ;;  %v560_v50 = vld [vmem:[#allocation5 + $0xd38] sm:$0xff]  ;;  %v303_v51 = vld [vmem:[#allocation5 + $0x530] sm:$0xff] }
 0x11f   :  { %1308 = vmatprep.subr.mxu1 %v632_v53  ;;  %1220 = vmatpush2.msra.mxu0 %v375_v54  ;;  %v559_v52 = vld [vmem:[#allocation5 + $0xd30] sm:$0xff]  ;;  %v1589_v53 = vld [vmem:[#allocation3 + $0x40] sm:$0xff] }
 0x120   :  { %1309 = vmatpush2.msra.mxu1 %v631_v55  ;;  %1221 = vmatprep.subr.mxu0 %v368_v59  ;;  %v1590_v54 = vld [vmem:[#allocation3 + $0x50] sm:$0xff]  ;;  %v296_v55 = vld [vmem:[#allocation5 + $0x4f8] sm:$0xff] }
 0x121   :  { %1310 = vmatprep.subr.mxu1 %v624_v62  ;;  %1222 = vmatpush2.msra.mxu0 %v367_v0  ;;  %v295_v59 = vld [vmem:[#allocation5 + $0x4f0] sm:$0xff]  ;;  %v1591_v0 = vld [vmem:[#allocation3 + $0x68] sm:$0xff] }
 0x122   :  { %1311 = vmatpush2.msra.mxu1 %v623_v4  ;;  %1223 = vmatprep.subr.mxu0 %v360_v5  ;;  %v551_v62 = vld [vmem:[#allocation5 + $0xcf0] sm:$0xff]  ;;  %v1592_v4 = vld [vmem:[#allocation3 + $0x78] sm:$0xff] }
 0x123   :  { %1312 = vmatprep.subr.mxu1 %v616_v6  ;;  %1224 = vmatpush2.msra.mxu0 %v359_v7  ;;  %v288_v5 = vld [vmem:[#allocation5 + $0x4b8] sm:$0xff]  ;;  %v287_v7 = vld [vmem:[#allocation5 + $0x4b0] sm:$0xff] }
 0x124   :  { %1313 = vmatpush2.msra.mxu1 %v615_v10  ;;  %1225 = vmatprep.subr.mxu0 %v352_v14  ;;  %v544_v6 = vld [vmem:[#allocation5 + $0xcb8] sm:$0xff]  ;;  %v543_v10 = vld [vmem:[#allocation5 + $0xcb0] sm:$0xff]  ;;  %v1593_v14 = vld [vmem:[#allocation3 + $0x60] sm:$0xff] }
 0x125   :  { %1314 = vmatprep.subr.mxu1 %v608_v15  ;;  %1226 = vmatpush2.msra.mxu0 %v351_v16  ;;  %v1594_v15 = vld [vmem:[#allocation3 + $0x70] sm:$0xff]  ;;  %v280_v16 = vld [vmem:[#allocation5 + $0x478] sm:$0xff] }
 0x126   :  { %1315 = vmatpush2.msra.mxu1 %v607_v17  ;;  %1227 = vmatprep.subr.mxu0 %v344_v18  ;;  %v536_v17 = vld [vmem:[#allocation5 + $0xc78] sm:$0xff]  ;;  %v279_v18 = vld [vmem:[#allocation5 + $0x470] sm:$0xff] }
 0x127   :  { %1316 = vmatprep.subr.mxu1 %v600_v19  ;;  %1228 = vmatpush2.msra.mxu0 %v343_v20  ;;  %v535_v19 = vld [vmem:[#allocation5 + $0xc70] sm:$0xff]  ;;  %v272_v20 = vld [vmem:[#allocation5 + $0x438] sm:$0xff] }
 0x128   :  { %1317 = vmatpush2.msra.mxu1 %v599_v21  ;;  %1229 = vmatprep.subr.mxu0 %v336_v23  ;;  %v528_v21 = vld [vmem:[#allocation5 + $0xc38] sm:$0xff]  ;;  %v527_v23 = vld [vmem:[#allocation5 + $0xc30] sm:$0xff] }
 0x129   :  { %1318 = vmatprep.subr.mxu1 %v592_v24  ;;  %1230 = vmatpush2.msra.mxu0 %v335_v26  ;;  %v715_v30 = vpop.f32.mrf.mxu0 }
 0x12a   :  { %1319 = vmatpush2.msra.mxu1 %v591_v27  ;;  %v804_v31 = vpop.f32.mrf.mxu1  ;;  %1231 = vmatprep.subr.mxu0 %v328_v44 }
 0x12b   :  { %1320 = vmatprep.subr.mxu1 %v584_v45  ;;  %v805_v63 = vadd.f32 %v804_v31, %v715_v30  ;;  %1075 = vmatprep.mubr.f32.mxu0 %v1783_v57  ;;  %v717_v33 = vpop.f32.mrf.mxu0 }
 0x12c   :  { %1164 = vmatprep.mubr.f32.mxu1 %v1786_v32  ;;  %v806_v1 = vpop.f32.mrf.mxu1  ;;  %1232 = vmatpush2.msra.mxu0 %v327_v48 }
 0x12d   :  { %1321 = vmatpush2.msra.mxu1 %v583_v49  ;;  %v1502_v8 = vadd.f32 %v1778_v29, %v805_v63  ;;  %v807_v9 = vadd.f32 %v806_v1, %v717_v33  ;;  %1076 = vmatmul.mubr.f32.gmra.mxu0 %v1790_v12 }
 0x12e   :  { %1165 = vmatmul.mubr.f32.gmra.mxu1 %v1793_v13  ;;  %1233 = vmatprep.subr.mxu0 %v320_v60 }
 0x12f   :  { %1322 = vmatprep.subr.mxu1 %v576_v61  ;;  %1534 = vst [vmem:[%s1930_s3] sm:$0xff] %v1502_v8  ;;  %v1503_v40 = vadd.f32 %v1781_v56, %v807_v9  ;;  %1234 = vmatpush2.msra.mxu0 %v319_v34  ;;  %v1472_v34 = vsub.s32 2, %v1771_v11  ;;  %v1476_v9 = vsub.s32 3, %v1771_v11 }
 0x130   :  { %1323 = vmatpush2.msra.mxu1 %v575_v2  ;;  %1235 = vmatprep.subr.mxu0 %v312_v36 }
 0x131   :  { %1324 = vmatprep.subr.mxu1 %v568_v37  ;;  %1535 = vst [vmem:[%s1930_s3 + $0x8] sm:$0xff] %v1503_v40  ;;  %1081 = vmatprep.mubr.f32.mxu0 %v1803_v43 }
 0x132   :  { %1170 = vmatprep.mubr.f32.mxu1 %v1806_v46  ;;  %1236 = vmatpush2.msra.mxu0 %v311_v41 }
 0x133   :  { %1325 = vmatpush2.msra.mxu1 %v567_v42  ;;  %1082 = vmatmul.mubr.f32.gmra.mxu0 %v1589_v53 }
 0x134   :  { %1171 = vmatmul.mubr.f32.gmra.mxu1 %v1590_v54  ;;  %1237 = vmatprep.subr.mxu0 %v304_v47 }
 0x135   :  { %1326 = vmatprep.subr.mxu1 %v560_v50  ;;  %1238 = vmatpush2.msra.mxu0 %v303_v51 }
 0x136   :  { %1327 = vmatpush2.msra.mxu1 %v559_v52  ;;  %1239 = vmatprep.subr.mxu0 %v296_v55 }
 0x137   :  { %1328 = vmatprep.subr.mxu1 %v552_v58  ;;  %1087 = vmatprep.mubr.f32.mxu0 %v1591_v0 }
 0x138   :  { %1176 = vmatprep.mubr.f32.mxu1 %v1592_v4  ;;  %1240 = vmatpush2.msra.mxu0 %v295_v59 }
 0x139   :  { %1329 = vmatpush2.msra.mxu1 %v551_v62  ;;  %1088 = vmatmul.mubr.f32.gmra.mxu0 %v1593_v14 }
 0x13a   :  { %1177 = vmatmul.mubr.f32.gmra.mxu1 %v1594_v15  ;;  %1241 = vmatprep.subr.mxu0 %v288_v5 }
 0x13b   :  { %1330 = vmatprep.subr.mxu1 %v544_v6  ;;  %1242 = vmatpush2.msra.mxu0 %v287_v7 }
 0x13c   :  { %1331 = vmatpush2.msra.mxu1 %v543_v10  ;;  %1243 = vmatprep.subr.mxu0 %v280_v16 }
 0x13d   :  { %1332 = vmatprep.subr.mxu1 %v536_v17  ;;  %1244 = vmatpush2.msra.mxu0 %v279_v18 }
 0x13e   :  { %1333 = vmatpush2.msra.mxu1 %v535_v19  ;;  %1245 = vmatprep.subr.mxu0 %v272_v20  ;;  %v1480_v19 = vsub.s32 4, %v1771_v11 }
 0x13f   :  { %1334 = vmatprep.subr.mxu1 %v528_v21  ;;  %1246 = vmatpush2.msra.mxu0 %v271_v22  ;;  %v1484_v22 = vsub.s32 5, %v1771_v11 }
 0x140   :  { %1247 = vmatprep.mubr.f32.mxu0 %v1759_v3  ;;  %1335 = vmatpush2.msra.mxu1 %v527_v23 }
 0x141   :  { %1336 = vmatprep.mubr.f32.mxu1 %v1762_v35  ;;  %1248 = vmatmul.mubr.f32.vlgmr.msra.gmra.mxu0 %v1765_v38 }
 0x142   :  { %1337 = vmatmul.mubr.f32.vlgmr.msra.gmra.mxu1 %v1768_v39  ;;  %1253 = vmatprep.mubr.f32.mxu0 %v1783_v57 }
 0x143   :  { %1342 = vmatprep.mubr.f32.mxu1 %v1786_v32 }
 0x145   :  { %1254 = vmatmul.mubr.f32.gmra.mxu0 %v1790_v12 }
 0x146   :  { %1343 = vmatmul.mubr.f32.gmra.mxu1 %v1793_v13  ;;  %1259 = vmatprep.mubr.f32.mxu0 %v1803_v43  ;;  %v1473_v13 = vrot.slane %v1774_v25, %v1472_v34 }
 0x147   :  { %1348 = vmatprep.mubr.f32.mxu1 %v1806_v46 }
 0x149   :  { %1260 = vmatmul.mubr.f32.gmra.mxu0 %v1589_v53 }
 0x14a   :  { %1349 = vmatmul.mubr.f32.gmra.mxu1 %v1590_v54  ;;  %1265 = vmatprep.mubr.f32.mxu0 %v1591_v0 }
 0x14b   :  { %1354 = vmatprep.mubr.f32.mxu1 %v1592_v4 }
 0x14d   :  { %1266 = vmatmul.mubr.f32.gmra.mxu0 %v1593_v14 }
 0x14e   :  { %1355 = vmatmul.mubr.f32.gmra.mxu1 %v1594_v15 }
 0x15e   :  { %v721_v3 = vpop.f32.mrf.mxu0 }
 0x15f   :  { %v810_v35 = vpop.f32.mrf.mxu1 }
 0x160   :  { %v811_v38 = vadd.f32 %v810_v35, %v721_v3  ;;  %v723_v39 = vpop.f32.mrf.mxu0  ;;  %v1481_v3 = vrot.slane %v1774_v25, %v1480_v19 }
 0x161   :  { %v812_v24 = vpop.f32.mrf.mxu1 }
 0x162   :  { %v1510_v26 = vadd.f32 %v1778_v29, %v811_v38  ;;  %v813_v27 = vadd.f32 %v812_v24, %v723_v39  ;;  %v1485_v24 = vrot.slane %v1774_v25, %v1484_v22 }
 0x164   :  { %1542 = vst [vmem:[%s1930_s3 + $0x40] sm:$0xff] %v1510_v26  ;;  %v1511_v28 = vadd.f32 %v1781_v56, %v813_v27  ;;  %v727_v44 = vpop.f32.mrf.mxu0 }
 0x165   :  { %v816_v45 = vpop.f32.mrf.mxu1 }
 0x166   :  { %1543 = vst [vmem:[%s1930_s3 + $0x48] sm:$0xff] %v1511_v28  ;;  %v817_v48 = vadd.f32 %v816_v45, %v727_v44  ;;  %v729_v49 = vpop.f32.mrf.mxu0 }
 0x167   :  { %v818_v30 = vpop.f32.mrf.mxu1 }
 0x168   :  { %v1518_v31 = vadd.f32 %v1778_v29, %v817_v48  ;;  %v819_v63 = vadd.f32 %v818_v30, %v729_v49 }
 0x16a   :  { %1550 = vst [vmem:[%s1930_s3 + $0x80] sm:$0xff] %v1518_v31  ;;  %v1519_v57 = vadd.f32 %v1781_v56, %v819_v63  ;;  %v733_v32 = vpop.f32.mrf.mxu0 }
 0x16b   :  { %v822_v60 = vpop.f32.mrf.mxu1 }
 0x16c   :  { %1551 = vst [vmem:[%s1930_s3 + $0x88] sm:$0xff] %v1519_v57  ;;  %v823_v61 = vadd.f32 %v822_v60, %v733_v32  ;;  %v735_v33 = vpop.f32.mrf.mxu0 }
 0x16d   :  { %v824_v1 = vpop.f32.mrf.mxu1 }
 0x16e   :  { %v1526_v2 = vadd.f32 %v1778_v29, %v823_v61  ;;  %v825_v8 = vadd.f32 %v824_v1, %v735_v33  ;;  %v1477_v29 = vrot.slane %v1774_v25, %v1476_v9 }
 0x170   :  { %1558 = vst [vmem:[%s1930_s3 + $0xc0] sm:$0xff] %v1526_v2  ;;  %v1527_v12 = vadd.f32 %v1781_v56, %v825_v8 }
 0x171   :  { %v893_v36 = vpop.f32.mrf.mxu0 }
 0x172   :  { %1559 = vst [vmem:[%s1930_s3 + $0xc8] sm:$0xff] %v1527_v12  ;;  %v982_v37 = vpop.f32.mrf.mxu1 }
 0x173   :  { %v983_v40 = vadd.f32 %v982_v37, %v893_v36  ;;  %v895_v41 = vpop.f32.mrf.mxu0 }
 0x174   :  { %v984_v42 = vpop.f32.mrf.mxu1 }
 0x175   :  { %v1504_v43 = vadd.f32 %v1473_v13, %v983_v40  ;;  %v985_v46 = vadd.f32 %v984_v42, %v895_v41 }
 0x177   :  { %1536 = vst [vmem:[%s1930_s3 + $0x10] sm:$0xff] %v1504_v43  ;;  %v1505_v56 = vadd.f32 %v1477_v29, %v985_v46  ;;  %v1488_v43 = vsub.s32 6, %v1771_v11 }
 0x179   :  { %1537 = vst [vmem:[%s1930_s3 + $0x18] sm:$0xff] %v1505_v56  ;;  %v1492_v56 = vsub.s32 7, %v1771_v11 }
 0x1a6   :  { %v899_v47 = vpop.f32.mrf.mxu0 }
 0x1a7   :  { %v988_v50 = vpop.f32.mrf.mxu1 }
 0x1a8   :  { %v989_v51 = vadd.f32 %v988_v50, %v899_v47  ;;  %v901_v52 = vpop.f32.mrf.mxu0  ;;  %v1489_v47 = vrot.slane %v1774_v25, %v1488_v43 }
 0x1a9   :  { %v990_v53 = vpop.f32.mrf.mxu1 }
 0x1aa   :  { %v1512_v54 = vadd.f32 %v1473_v13, %v989_v51  ;;  %v991_v55 = vadd.f32 %v990_v53, %v901_v52  ;;  %v1493_v53 = vrot.slane %v1774_v25, %v1492_v56 }
 0x1ac   :  { %1544 = vst [vmem:[%s1930_s3 + $0x50] sm:$0xff] %v1512_v54  ;;  %v1513_v58 = vadd.f32 %v1477_v29, %v991_v55  ;;  %v905_v59 = vpop.f32.mrf.mxu0 }
 0x1ad   :  { %v994_v62 = vpop.f32.mrf.mxu1 }
 0x1ae   :  { %1545 = vst [vmem:[%s1930_s3 + $0x58] sm:$0xff] %v1513_v58  ;;  %v995_v0 = vadd.f32 %v994_v62, %v905_v59  ;;  %v907_v4 = vpop.f32.mrf.mxu0 }
 0x1af   :  { %v996_v5 = vpop.f32.mrf.mxu1 }
 0x1b0   :  { %v1520_v6 = vadd.f32 %v1473_v13, %v995_v0  ;;  %v997_v7 = vadd.f32 %v996_v5, %v907_v4 }
 0x1b2   :  { %1552 = vst [vmem:[%s1930_s3 + $0x90] sm:$0xff] %v1520_v6  ;;  %v1521_v10 = vadd.f32 %v1477_v29, %v997_v7  ;;  %v911_v14 = vpop.f32.mrf.mxu0 }
 0x1b3   :  { %v1000_v15 = vpop.f32.mrf.mxu1 }
 0x1b4   :  { %1553 = vst [vmem:[%s1930_s3 + $0x98] sm:$0xff] %v1521_v10  ;;  %v1001_v16 = vadd.f32 %v1000_v15, %v911_v14  ;;  %v913_v17 = vpop.f32.mrf.mxu0 }
 0x1b5   :  { %v1002_v18 = vpop.f32.mrf.mxu1 }
 0x1b6   :  { %v1528_v20 = vadd.f32 %v1473_v13, %v1001_v16  ;;  %v1003_v21 = vadd.f32 %v1002_v18, %v913_v17 }
 0x1b8   :  { %1560 = vst [vmem:[%s1930_s3 + $0xd0] sm:$0xff] %v1528_v20  ;;  %v1529_v23 = vadd.f32 %v1477_v29, %v1003_v21 }
 0x1b9   :  { %v1071_v35 = vpop.f32.mrf.mxu0 }
 0x1ba   :  { %1561 = vst [vmem:[%s1930_s3 + $0xd8] sm:$0xff] %v1529_v23  ;;  %v1160_v38 = vpop.f32.mrf.mxu1 }
 0x1bb   :  { %v1161_v39 = vadd.f32 %v1160_v38, %v1071_v35  ;;  %v1073_v26 = vpop.f32.mrf.mxu0 }
 0x1bc   :  { %v1162_v27 = vpop.f32.mrf.mxu1 }
 0x1bd   :  { %v1506_v28 = vadd.f32 %v1481_v3, %v1161_v39  ;;  %v1163_v44 = vadd.f32 %v1162_v27, %v1073_v26 }
 0x1bf   :  { %1538 = vst [vmem:[%s1930_s3 + $0x20] sm:$0xff] %v1506_v28  ;;  %v1507_v45 = vadd.f32 %v1485_v24, %v1163_v44 }
 0x1c1   :  { %1539 = vst [vmem:[%s1930_s3 + $0x28] sm:$0xff] %v1507_v45 }
 0x1ed   :  { %v1077_v48 = vpop.f32.mrf.mxu0 }
 0x1ee   :  { %v1166_v49 = vpop.f32.mrf.mxu1 }
 0x1ef   :  { %v1167_v30 = vadd.f32 %v1166_v49, %v1077_v48  ;;  %v1079_v31 = vpop.f32.mrf.mxu0 }
 0x1f0   :  { %v1168_v63 = vpop.f32.mrf.mxu1 }
 0x1f1   :  { %v1514_v57 = vadd.f32 %v1481_v3, %v1167_v30  ;;  %v1169_v32 = vadd.f32 %v1168_v63, %v1079_v31 }
 0x1f3   :  { %1546 = vst [vmem:[%s1930_s3 + $0x60] sm:$0xff] %v1514_v57  ;;  %v1515_v60 = vadd.f32 %v1485_v24, %v1169_v32  ;;  %v1083_v61 = vpop.f32.mrf.mxu0 }
 0x1f4   :  { %v1172_v33 = vpop.f32.mrf.mxu1 }
 0x1f5   :  { %1547 = vst [vmem:[%s1930_s3 + $0x68] sm:$0xff] %v1515_v60  ;;  %v1173_v1 = vadd.f32 %v1172_v33, %v1083_v61  ;;  %v1085_v34 = vpop.f32.mrf.mxu0 }
 0x1f6   :  { %v1174_v2 = vpop.f32.mrf.mxu1 }
 0x1f7   :  { %v1522_v8 = vadd.f32 %v1481_v3, %v1173_v1  ;;  %v1175_v9 = vadd.f32 %v1174_v2, %v1085_v34 }
 0x1f9   :  { %1554 = vst [vmem:[%s1930_s3 + $0xa0] sm:$0xff] %v1522_v8  ;;  %v1523_v12 = vadd.f32 %v1485_v24, %v1175_v9  ;;  %v1089_v13 = vpop.f32.mrf.mxu0 }
 0x1fa   :  { %v1178_v36 = vpop.f32.mrf.mxu1 }
 0x1fb   :  { %1555 = vst [vmem:[%s1930_s3 + $0xa8] sm:$0xff] %v1523_v12  ;;  %v1179_v37 = vadd.f32 %v1178_v36, %v1089_v13  ;;  %v1091_v40 = vpop.f32.mrf.mxu0 }
 0x1fc   :  { %v1180_v29 = vpop.f32.mrf.mxu1 }
 0x1fd   :  { %v1530_v41 = vadd.f32 %v1481_v3, %v1179_v37  ;;  %v1181_v42 = vadd.f32 %v1180_v29, %v1091_v40 }
 0x1ff   :  { %1562 = vst [vmem:[%s1930_s3 + $0xe0] sm:$0xff] %v1530_v41  ;;  %v1531_v46 = vadd.f32 %v1485_v24, %v1181_v42 }
 0x201   :  { %1563 = vst [vmem:[%s1930_s3 + $0xe8] sm:$0xff] %v1531_v46  ;;  %v1249_v50 = vpop.f32.mrf.mxu0 }
 0x202   :  { %v1338_v51 = vpop.f32.mrf.mxu1 }
 0x203   :  { %v1339_v52 = vadd.f32 %v1338_v51, %v1249_v50  ;;  %v1251_v54 = vpop.f32.mrf.mxu0 }
 0x204   :  { %v1340_v55 = vpop.f32.mrf.mxu1 }
 0x205   :  { %v1508_v58 = vadd.f32 %v1489_v47, %v1339_v52  ;;  %v1341_v59 = vadd.f32 %v1340_v55, %v1251_v54  ;;  %v1255_v62 = vpop.f32.mrf.mxu0 }
 0x206   :  { %v1344_v0 = vpop.f32.mrf.mxu1 }
 0x207   :  { %1540 = vst [vmem:[%s1930_s3 + $0x30] sm:$0xff] %v1508_v58  ;;  %v1509_v11 = vadd.f32 %v1493_v53, %v1341_v59  ;;  %v1345_v4 = vadd.f32 %v1344_v0, %v1255_v62  ;;  %v1257_v5 = vpop.f32.mrf.mxu0 }
 0x208   :  { %v1346_v6 = vpop.f32.mrf.mxu1 }
 0x209   :  { %1541 = vst [vmem:[%s1930_s3 + $0x38] sm:$0xff] %v1509_v11  ;;  %v1516_v7 = vadd.f32 %v1489_v47, %v1345_v4  ;;  %v1347_v25 = vadd.f32 %v1346_v6, %v1257_v5  ;;  %v1261_v10 = vpop.f32.mrf.mxu0 }
 0x20a   :  { %v1350_v14 = vpop.f32.mrf.mxu1 }
 0x20b   :  { %1548 = vst [vmem:[%s1930_s3 + $0x70] sm:$0xff] %v1516_v7  ;;  %v1517_v15 = vadd.f32 %v1493_v53, %v1347_v25  ;;  %v1351_v16 = vadd.f32 %v1350_v14, %v1261_v10  ;;  %v1263_v17 = vpop.f32.mrf.mxu0 }
 0x20c   :  { %v1352_v18 = vpop.f32.mrf.mxu1 }
 0x20d   :  { %1549 = vst [vmem:[%s1930_s3 + $0x78] sm:$0xff] %v1517_v15  ;;  %v1524_v19 = vadd.f32 %v1489_v47, %v1351_v16  ;;  %v1353_v20 = vadd.f32 %v1352_v18, %v1263_v17  ;;  %v1267_v21 = vpop.f32.mrf.mxu0 }
 0x20e   :  { %v1356_v22 = vpop.f32.mrf.mxu1 }
 0x20f   :  { %1556 = vst [vmem:[%s1930_s3 + $0xb0] sm:$0xff] %v1524_v19  ;;  %v1525_v23 = vadd.f32 %v1493_v53, %v1353_v20  ;;  %v1357_v3 = vadd.f32 %v1356_v22, %v1267_v21  ;;  %v1269_v35 = vpop.f32.mrf.mxu0 }
 0x210   :  { %v1358_v38 = vpop.f32.mrf.mxu1 }
 0x211   :  { %1557 = vst [vmem:[%s1930_s3 + $0xb8] sm:$0xff] %v1525_v23  ;;  %v1532_v39 = vadd.f32 %v1489_v47, %v1357_v3  ;;  %v1359_v24 = vadd.f32 %v1358_v38, %v1269_v35 }
 0x213   :  { %1564 = vst [vmem:[%s1930_s3 + $0xf0] sm:$0xff] %v1532_v39  ;;  %v1533_v26 = vadd.f32 %v1493_v53, %v1359_v24 }
 0x215   :  { %1565 = vst [vmem:[%s1930_s3 + $0xf8] sm:$0xff] %v1533_v26 }
 0x216   :  { %1570 = vsyncpa [#allocation4], 1 }
 0x217   :  { %1571 = vsyncpa [#allocation6], 1 }

</bundles_post_ra>
